<compile_context>
chip_gen: v6e
topology: v6e:2x2x1
jax: 0.10.0
libtpu: 0.0.40
codegen_flags: <defaults>
</compile_context>

<pallas_src>
import functools
import math

import jax
import jax.numpy as jnp
from jax.experimental import pallas as pl
from jax.experimental.pallas import tpu as pltpu


def _layer_norm(x, w, b, eps=1e-5):
    # x: (L, D), w/b: (1, D) -- all f32 (elementwise math stays f32)
    mean = jnp.mean(x, axis=-1, keepdims=True)
    var = jnp.mean(jnp.square(x - mean), axis=-1, keepdims=True)
    inv = jax.lax.rsqrt(var + eps)
    return (x - mean) * inv * w + b


def encoder_layer_kernel(
    # per-(batch, q-tile) tensors
    q_ref, kv_ref, mask_ref, npm_ref,
    # attention weights (matmul weights pre-cast to bf16 in the wrapper)
    wq_ref, bq_ref, wk_ref, bk_ref, wv_ref, bv_ref, wfc_ref, bfc_ref,
    ln1w_ref, ln1b_ref,
    # ffn weights
    w1_ref, b1_ref, w2_ref, b2_ref, ln2w_ref, ln2b_ref,
    # output
    out_ref,
    # scratch: per-batch cached head-major K / V projections (bf16)
    kh_scr, vh_scr,
    *, n_head, d_k, d_v, block_k, exp_bf16,
):
    f32 = jnp.float32
    bf16 = jnp.bfloat16

    qi = pl.program_id(1)
    Tq = q_ref.shape[1]
    Lk = kv_ref.shape[1]

    # ---- K/V projection + head-major relayout: ONCE per batch element ----
    # qi is the innermost 'arbitrary' grid axis, so the scratch written at
    # qi == 0 stays valid for every Q-tile of the same batch element.
    @pl.when(qi == 0)
    def _():
        kl = kv_ref[0]                                    # (Lk, d_model) bf16
        K = jnp.dot(kl, wk_ref[...], preferred_element_type=f32) + bk_ref[...]
        V = jnp.dot(kl, wv_ref[...], preferred_element_type=f32) + bv_ref[...]
        # bf16 BEFORE the XLU transpose: halves the relayout bytes.
        kh_scr[...] = jnp.transpose(K.astype(bf16).reshape(Lk, n_head, d_k), (1, 0, 2))
        vh_scr[...] = jnp.transpose(V.astype(bf16).reshape(Lk, n_head, d_v), (1, 0, 2))

    ql = q_ref[0]                                         # (Tq, d_model) bf16
    residual = ql.astype(f32)
    mask = mask_ref[0]                                    # (Tq, Lk) bf16, 1.0 == masked
    npm = npm_ref[0]                                      # (Tq, 1) f32

    # ---- Q projection (1/sqrt(d_k) already folded into Wq/bq) ----
    Q = jnp.dot(ql, wq_ref[...], preferred_element_type=f32) + bq_ref[...]
    Qh = jnp.transpose(Q.astype(bf16).reshape(Tq, n_head, d_k), (1, 0, 2))   # (H,Tq,dk)

    # ---- all-head attention, streamed over Lk with an online softmax ----
    # Bounds the live attention working set to O(H*Tq*block_k) instead of
    # materializing the full (H, Tq, Lk) f32 scores/exp/probs.
    neg_big = jnp.float32(-1e10)
    m_i = jnp.full((n_head, Tq, 1), -jnp.inf, f32)
    l_i = jnp.zeros((n_head, Tq, 1), f32)
    acc = jnp.zeros((n_head, Tq, d_v), f32)

    num_kb = Lk // block_k
    for kb in range(num_kb):      # static (small) trip count -> unrolled
        lo = kb * block_k
        hi = lo + block_k
        k_blk = kh_scr[:, lo:hi, :]                       # (H, bk, dk) bf16
        v_blk = vh_scr[:, lo:hi, :]                       # (H, bk, dv) bf16
        m_blk = mask[:, lo:hi]                            # (Tq, bk) bf16

        s = jnp.einsum('hqd,hkd->hqk', Qh, k_blk,
                       preferred_element_type=f32)        # (H, Tq, bk)
        # torch masked_fill semantics (1.0 == masked)
        s = jnp.where(m_blk[None, :, :] > 0.5, neg_big, s)

        m_new = jnp.maximum(m_i, jnp.max(s, axis=-1, keepdims=True))
        alpha = jnp.exp(m_i - m_new)
        if exp_bf16:    # bf16 EUP exp on v6e/v7x only (never v5e)
            p = jnp.exp((s - m_new).astype(bf16)).astype(f32)
        else:
            p = jnp.exp(s - m_new)
        l_i = alpha * l_i + jnp.sum(p, axis=-1, keepdims=True)
        acc = alpha * acc + jnp.einsum('hqk,hkv->hqv', p.astype(bf16), v_blk,
                                       preferred_element_type=f32)
        m_i = m_new

    # TODO(synk): attention dropout (p=0.1) omitted -- eval mode (identity).
    # TODO(synk): head-pair packing to fill the 256-deep MXU (d_k<=64) not done.
    O = acc * pl.reciprocal(l_i, approx=True)             # (H, Tq, dv) f32

    # ---- concat heads + output projection as ONE wide matmul ----
    O_flat = jnp.transpose(O.astype(bf16), (1, 0, 2)).reshape(Tq, n_head * d_v)
    attn_out = jnp.dot(O_flat, wfc_ref[...], preferred_element_type=f32) + bfc_ref[...]
    attn_out = _layer_norm(attn_out + residual, ln1w_ref[...], ln1b_ref[...])
    attn_out = attn_out * npm                             # non_pad_mask

    # ---- position-wise FFN (Conv1d kernel-size-1 == per-position linear) ----
    ffn_res = attn_out
    h1 = jnp.dot(attn_out.astype(bf16), w1_ref[...],
                 preferred_element_type=f32) + b1_ref[...]
    h1 = jnp.maximum(h1, 0.0)
    h2 = jnp.dot(h1.astype(bf16), w2_ref[...],
                 preferred_element_type=f32) + b2_ref[...]
    ffn_out = _layer_norm(h2 + ffn_res, ln2w_ref[...], ln2b_ref[...])
    ffn_out = ffn_out * npm                               # non_pad_mask

    out_ref[0] = ffn_out.astype(out_ref.dtype)


def _vmem_capacity_bytes():
    try:
        return int(pltpu.get_tpu_info().vmem_capacity_bytes)
    except Exception:
        return 128 * 1024 * 1024


def _use_bf16_exp():
    # bf16 exp only where EUP/VALU handle bf16 natively (v6e / v7x); never v5e.
    try:
        kind = jax.devices()[0].device_kind.lower()
    except Exception:
        return False
    return ("v6" in kind) or ("v7" in kind)


def _pick_block_q(lq, vmem_cap):
    # v7x-class chips have 64 MiB VMEM per TC -> default 128-row Q tiles;
    # 128-MiB chips (v5e/v6e) can afford bigger tiles (fewer grid steps).
    max_b = 128 if vmem_cap <= 80 * 1024 * 1024 else 512
    if lq <= max_b:
        return max(8, ((lq + 7) // 8) * 8)
    return max_b


def _pick_block_k(lk):
    if lk <= 1024:
        return lk
    for cand in (512, 256, 128):
        if lk % cand == 0:
            return cand
    return lk


def prepare_layer_params(params, d_k):
    """Cast matmul weights to bf16 (halves DMA/VMEM) and fold 1/sqrt(d_k) into Wq/bq."""
    (wq, bq, wk, bk, wv, bv, wfc, bfc, ln1w, ln1b,
     w1, b1, w2, b2, ln2w, ln2b) = params
    bf16, f32 = jnp.bfloat16, jnp.float32
    inv_temp = 1.0 / math.sqrt(float(d_k))
    # TODO(synk): optional fp8 weight quantization for v7x not implemented.
    return [
        (wq * inv_temp).astype(bf16), (bq * inv_temp).astype(f32),
        wk.astype(bf16), bk.astype(f32),
        wv.astype(bf16), bv.astype(f32),
        wfc.astype(bf16), bfc.astype(f32),
        ln1w.astype(f32), ln1b.astype(f32),
        w1.astype(bf16), b1.astype(f32),
        w2.astype(bf16), b2.astype(f32),
        ln2w.astype(f32), ln2b.astype(f32),
    ]


def run_encoder_layer(q, kv, attn_mask_bf16, non_pad_mask, params, *,
                      n_head, d_k, d_v, block_q, block_k, exp_bf16,
                      vmem_cap, out_dtype):
    B, Lq, d_model = q.shape
    _, Lk, _ = kv.shape
    assert Lq % block_q == 0, (Lq, block_q)
    n_q = Lq // block_q
    d_inner = params[10].shape[1]

    def const_spec(p):
        shape = p.shape
        # TODO(synk): pl.Buffered(1) on these constant-index weight specs would
        # reclaim the dead second rotating buffer; left default for portability.
        return pl.BlockSpec(shape, lambda b, qi: (0,) * len(shape))

    in_specs = [
        pl.BlockSpec((1, block_q, d_model), lambda b, qi: (b, qi, 0)),   # q tile (bf16)
        pl.BlockSpec((1, Lk, d_model), lambda b, qi: (b, 0, 0)),         # full kv (bf16)
        pl.BlockSpec((1, block_q, Lk), lambda b, qi: (b, qi, 0)),        # mask tile (bf16)
        pl.BlockSpec((1, block_q, 1), lambda b, qi: (b, qi, 0)),         # non_pad tile
    ] + [const_spec(p) for p in params]

    kernel = functools.partial(encoder_layer_kernel, n_head=n_head, d_k=d_k,
                               d_v=d_v, block_k=block_k, exp_bf16=exp_bf16)

    # advisory cost estimate (helps XLA schedule the per-layer calls)
    flops = 2 * B * (
        Lq * d_model * n_head * d_k                 # Q proj
        + Lk * d_model * n_head * (d_k + d_v)       # K, V proj (once per batch)
        + n_head * Lq * Lk * (d_k + d_v)            # QK^T and PV
        + Lq * n_head * d_v * d_model               # output proj
        + 2 * Lq * d_model * d_inner                # FFN
    )
    transcendentals = B * n_head * Lq * Lk
    param_bytes = sum(int(p.size) * p.dtype.itemsize for p in params)
    bytes_accessed = int(param_bytes
                         + q.size * 2 + kv.size * 2
                         + attn_mask_bf16.size * 2 + non_pad_mask.size * 4
                         + B * Lq * d_model * jnp.dtype(out_dtype).itemsize)

    # explicit VMEM budget: double-buffered activation tiles + resident weights
    # + per-batch cached K/V heads + in-flight compute intermediates.
    act_bytes = 2 * (block_q * d_model * 2 + Lk * d_model * 2
                     + block_q * Lk * 2 + block_q * 4 + block_q * d_model * 4)
    kv_cache_bytes = n_head * Lk * (d_k + d_v) * 2
    compute_bytes = (3 * n_head * block_q * block_k * 4
                     + 2 * n_head * block_q * d_v * 4
                     + block_q * d_inner * 4)
    needed = act_bytes + 2 * param_bytes + kv_cache_bytes + compute_bytes
    # never request the full physical VMEM (leave compiler headroom):
    # ~48 MiB on v7x (64 MiB phys), ~96 MiB on v5e/v6e (128 MiB phys).
    cap = int(vmem_cap * 3 // 4)
    vmem_limit = int(min(max(2 * needed, 32 * 1024 * 1024), cap))

    return pl.pallas_call(
        kernel,
        out_shape=jax.ShapeDtypeStruct((B, Lq, d_model), out_dtype),
        grid=(B, n_q),
        in_specs=in_specs,
        out_specs=pl.BlockSpec((1, block_q, d_model), lambda b, qi: (b, qi, 0)),
        scratch_shapes=[
            pltpu.VMEM((n_head, Lk, d_k), jnp.bfloat16),   # cached K heads
            pltpu.VMEM((n_head, Lk, d_v), jnp.bfloat16),   # cached V heads
        ],
        compiler_params=pltpu.CompilerParams(
            # qi must stay 'arbitrary' (in-order on one core) so the per-batch
            # cached K/V scratch written at qi == 0 is reused by all Q-tiles;
            # the batch axis remains 'parallel' for megacore sharding.
            dimension_semantics=("parallel", "arbitrary"),
            vmem_limit_bytes=vmem_limit),
        cost_estimate=pl.CostEstimate(
            flops=int(flops),
            transcendentals=int(transcendentals),
            bytes_accessed=int(bytes_accessed)),
    )(q, kv, attn_mask_bf16, non_pad_mask, *params)


def init_layer_params(key, d_model, d_inner, n_head, d_k, d_v):
    ks = jax.random.split(key, 8)
    std_qk = math.sqrt(2.0 / (d_model + d_k))
    std_v = math.sqrt(2.0 / (d_model + d_v))
    xavier_fc = math.sqrt(2.0 / (n_head * d_v + d_model))
    f32 = jnp.float32
    params = [
        jax.random.normal(ks[0], (d_model, n_head * d_k), f32) * std_qk,    # Wq (in,out)
        jnp.zeros((1, n_head * d_k), f32),                                   # bq
        jax.random.normal(ks[1], (d_model, n_head * d_k), f32) * std_qk,    # Wk
        jnp.zeros((1, n_head * d_k), f32),                                   # bk
        jax.random.normal(ks[2], (d_model, n_head * d_v), f32) * std_v,     # Wv
        jnp.zeros((1, n_head * d_v), f32),                                   # bv
        jax.random.normal(ks[3], (n_head * d_v, d_model), f32) * xavier_fc,  # Wfc
        jnp.zeros((1, d_model), f32),                                        # bfc
        jnp.ones((1, d_model), f32),                                         # ln1 weight
        jnp.zeros((1, d_model), f32),                                        # ln1 bias
        jax.random.normal(ks[4], (d_model, d_inner), f32) * 0.05,            # W1 (conv1d k=1)
        jnp.zeros((1, d_inner), f32),                                        # b1
        jax.random.normal(ks[5], (d_inner, d_model), f32) * 0.05,            # W2
        jnp.zeros((1, d_model), f32),                                        # b2
        jnp.ones((1, d_model), f32),                                         # ln2 weight
        jnp.zeros((1, d_model), f32),                                        # ln2 bias
    ]
    return params


def encoder_forward(src_seq, tgt_seq, non_pad_mask, attn_mask, layer_params,
                    *, n_head, d_k, d_v):
    B, Lq, d_model = tgt_seq.shape
    _, Lk, _ = src_seq.shape
    bf16 = jnp.bfloat16

    vmem_cap = _vmem_capacity_bytes()
    exp_bf16 = _use_bf16_exp()
    block_q = _pick_block_q(Lq, vmem_cap)
    block_k = _pick_block_k(Lk)
    lq_pad = ((Lq + block_q - 1) // block_q) * block_q

    # inter-layer activations + attn mask travel in bf16 (half the HBM traffic)
    q = tgt_seq.astype(bf16)
    kv = src_seq.astype(bf16)
    mask = attn_mask.astype(bf16)
    npm = non_pad_mask.astype(jnp.float32)

    # TODO(synk): a key-pad-only mask could ship as (B, 1, Lk); kept as the
    # module's general (B, Lq, Lk) mask to preserve semantics.

    if lq_pad != Lq:
        pad = lq_pad - Lq
        q = jnp.pad(q, ((0, 0), (0, pad), (0, 0)))
        mask = jnp.pad(mask, ((0, 0), (0, pad), (0, 0)), constant_values=1.0)
        npm = jnp.pad(npm, ((0, 0), (0, pad), (0, 0)))

    n_layers = len(layer_params)
    for li, params in enumerate(layer_params):
        prepared = prepare_layer_params(params, d_k)
        out_dtype = jnp.float32 if li == n_layers - 1 else bf16
        q = run_encoder_layer(q, kv, mask, npm, prepared,
                              n_head=n_head, d_k=d_k, d_v=d_v,
                              block_q=block_q, block_k=block_k,
                              exp_bf16=exp_bf16, vmem_cap=vmem_cap,
                              out_dtype=out_dtype)

    if lq_pad != Lq:
        q = q[:, :Lq, :]
    return q


if __name__ == "__main__":
    # small shapes consistent with the module
    n_layers, n_head = 2, 2
    d_k = d_v = 16
    d_model, d_inner = 32, 64
    B, Lq, Lk = 2, 8, 8

    key = jax.random.PRNGKey(0)
    k_src, k_tgt, k_mask, *k_layers = jax.random.split(key, 3 + n_layers)

    src_seq = jax.random.normal(k_src, (B, Lk, d_model), jnp.float32)
    tgt_seq = jax.random.normal(k_tgt, (B, Lq, d_model), jnp.float32)

    # attn_mask: 1.0 where masked (like torch bool mask True); mask last key pos
    attn_mask = jnp.zeros((B, Lq, Lk), jnp.float32).at[:, :, -1].set(1.0)
    # non_pad_mask: (B, Lq, 1), last query position is padding
    non_pad_mask = jnp.ones((B, Lq, 1), jnp.float32).at[:, -1, :].set(0.0)

    layer_params = [
        init_layer_params(k_layers[i], d_model, d_inner, n_head, d_k, d_v)
        for i in range(n_layers)
    ]

    out = encoder_forward(src_seq, tgt_seq, non_pad_mask, attn_mask, layer_params,
                          n_head=n_head, d_k=d_k, d_v=d_v)
    jax.block_until_ready(out)
    assert out.shape == (B, Lq, d_model)
    print("KERNEL_OK")
</pallas_src>

<mosaic_0001>
module attributes {stable_mosaic.version = 11 : i64} {
  func.func @encoder_layer_kernel(%arg0: i32, %arg1: i32, %arg2: memref<1x8x32xbf16, #tpu.memory_space<vmem>>, %arg3: memref<1x8x32xbf16, #tpu.memory_space<vmem>>, %arg4: memref<1x8x8xbf16, #tpu.memory_space<vmem>>, %arg5: memref<1x8x1xf32, #tpu.memory_space<vmem>>, %arg6: memref<32x32xbf16, #tpu.memory_space<vmem>>, %arg7: memref<1x32xf32, #tpu.memory_space<vmem>>, %arg8: memref<32x32xbf16, #tpu.memory_space<vmem>>, %arg9: memref<1x32xf32, #tpu.memory_space<vmem>>, %arg10: memref<32x32xbf16, #tpu.memory_space<vmem>>, %arg11: memref<1x32xf32, #tpu.memory_space<vmem>>, %arg12: memref<32x32xbf16, #tpu.memory_space<vmem>>, %arg13: memref<1x32xf32, #tpu.memory_space<vmem>>, %arg14: memref<1x32xf32, #tpu.memory_space<vmem>>, %arg15: memref<1x32xf32, #tpu.memory_space<vmem>>, %arg16: memref<32x64xbf16, #tpu.memory_space<vmem>>, %arg17: memref<1x64xf32, #tpu.memory_space<vmem>>, %arg18: memref<64x32xbf16, #tpu.memory_space<vmem>>, %arg19: memref<1x32xf32, #tpu.memory_space<vmem>>, %arg20: memref<1x32xf32, #tpu.memory_space<vmem>>, %arg21: memref<1x32xf32, #tpu.memory_space<vmem>>, %arg22: memref<1x8x32xbf16, #tpu.memory_space<vmem>>, %arg23: memref<2x8x16xbf16, #tpu.memory_space<vmem>>, %arg24: memref<2x8x16xbf16, #tpu.memory_space<vmem>>) attributes {dimension_semantics = [#tpu.dimension_semantics<parallel>, #tpu.dimension_semantics<arbitrary>], iteration_bounds = array<i64: 2, 1>, scalar_prefetch = 0 : i64, scratch_operands = 2 : i64, tpu.core_type = #tpu.core_type<tc>, window_params = [{transform_indices = @transform_0, window_bounds = array<i64: 1, 8, 32>}, {transform_indices = @transform_1, window_bounds = array<i64: 1, 8, 32>}, {transform_indices = @transform_2, window_bounds = array<i64: 1, 8, 8>}, {transform_indices = @transform_3, window_bounds = array<i64: 1, 8, 1>}, {pipeline_mode = #tpu.pipeline_mode<synchronous>, transform_indices = @transform_4, window_bounds = array<i64: 32, 32>}, {pipeline_mode = #tpu.pipeline_mode<synchronous>, transform_indices = @transform_5, window_bounds = array<i64: 1, 32>}, {pipeline_mode = #tpu.pipeline_mode<synchronous>, transform_indices = @transform_6, window_bounds = array<i64: 32, 32>}, {pipeline_mode = #tpu.pipeline_mode<synchronous>, transform_indices = @transform_7, window_bounds = array<i64: 1, 32>}, {pipeline_mode = #tpu.pipeline_mode<synchronous>, transform_indices = @transform_8, window_bounds = array<i64: 32, 32>}, {pipeline_mode = #tpu.pipeline_mode<synchronous>, transform_indices = @transform_9, window_bounds = array<i64: 1, 32>}, {pipeline_mode = #tpu.pipeline_mode<synchronous>, transform_indices = @transform_10, window_bounds = array<i64: 32, 32>}, {pipeline_mode = #tpu.pipeline_mode<synchronous>, transform_indices = @transform_11, window_bounds = array<i64: 1, 32>}, {pipeline_mode = #tpu.pipeline_mode<synchronous>, transform_indices = @transform_12, window_bounds = array<i64: 1, 32>}, {pipeline_mode = #tpu.pipeline_mode<synchronous>, transform_indices = @transform_13, window_bounds = array<i64: 1, 32>}, {pipeline_mode = #tpu.pipeline_mode<synchronous>, transform_indices = @transform_14, window_bounds = array<i64: 32, 64>}, {pipeline_mode = #tpu.pipeline_mode<synchronous>, transform_indices = @transform_15, window_bounds = array<i64: 1, 64>}, {pipeline_mode = #tpu.pipeline_mode<synchronous>, transform_indices = @transform_16, window_bounds = array<i64: 64, 32>}, {pipeline_mode = #tpu.pipeline_mode<synchronous>, transform_indices = @transform_17, window_bounds = array<i64: 1, 32>}, {pipeline_mode = #tpu.pipeline_mode<synchronous>, transform_indices = @transform_18, window_bounds = array<i64: 1, 32>}, {pipeline_mode = #tpu.pipeline_mode<synchronous>, transform_indices = @transform_19, window_bounds = array<i64: 1, 32>}, {transform_indices = @transform_20, window_bounds = array<i64: 1, 8, 32>}]} {
    %c0_i32 = arith.constant 0 : i32
    %0 = arith.cmpi eq, %arg1, %c0_i32 : i32
    %1 = arith.extui %0 : i1 to i32
    %c0_i32_0 = arith.constant 0 : i32
    %2 = arith.cmpi ne, %1, %c0_i32_0 : i32
    scf.if %2 {
      %c0_65 = arith.constant 0 : index
      %c0_66 = arith.constant 0 : index
      %c0_67 = arith.constant 0 : index
      %131 = vector.load %arg3[%c0_65, %c0_66, %c0_67] : memref<1x8x32xbf16, #tpu.memory_space<vmem>>, vector<1x8x32xbf16>
      %132 = vector.shape_cast %131 : vector<1x8x32xbf16> to vector<8x32xbf16>
      %c0_68 = arith.constant 0 : index
      %c0_69 = arith.constant 0 : index
      %133 = vector.load %arg8[%c0_68, %c0_69] : memref<32x32xbf16, #tpu.memory_space<vmem>>, vector<32x32xbf16>
      %cst_70 = arith.constant dense<0.000000e+00> : vector<8x32xf32>
      %134 = tpu.matmul %132, %133, %cst_70 {dimension_numbers = #tpu.dot_dimension_numbers<[1], [0], [0], [1], [0, 0, 1, 1], [], []>} : vector<8x32xbf16>, vector<32x32xbf16>, vector<8x32xf32> -> vector<8x32xf32>
      %c0_71 = arith.constant 0 : index
      %c0_72 = arith.constant 0 : index
      %135 = vector.load %arg9[%c0_71, %c0_72] : memref<1x32xf32, #tpu.memory_space<vmem>>, vector<1x32xf32>
      %136 = vector.broadcast %135 : vector<1x32xf32> to vector<8x32xf32>
      %137 = arith.addf %134, %136 : vector<8x32xf32>
      %c0_73 = arith.constant 0 : index
      %c0_74 = arith.constant 0 : index
      %138 = vector.load %arg10[%c0_73, %c0_74] : memref<32x32xbf16, #tpu.memory_space<vmem>>, vector<32x32xbf16>
      %cst_75 = arith.constant dense<0.000000e+00> : vector<8x32xf32>
      %139 = tpu.matmul %132, %138, %cst_75 {dimension_numbers = #tpu.dot_dimension_numbers<[1], [0], [0], [1], [0, 0, 1, 1], [], []>} : vector<8x32xbf16>, vector<32x32xbf16>, vector<8x32xf32> -> vector<8x32xf32>
      %c0_76 = arith.constant 0 : index
      %c0_77 = arith.constant 0 : index
      %140 = vector.load %arg11[%c0_76, %c0_77] : memref<1x32xf32, #tpu.memory_space<vmem>>, vector<1x32xf32>
      %141 = vector.broadcast %140 : vector<1x32xf32> to vector<8x32xf32>
      %142 = arith.addf %139, %141 : vector<8x32xf32>
      %143 = arith.truncf %137 : vector<8x32xf32> to vector<8x32xbf16>
      %144 = vector.shape_cast %143 : vector<8x32xbf16> to vector<8x2x16xbf16>
      %145 = tpu.transpose %144, [1, 0, 2] : vector<8x2x16xbf16> -> vector<2x8x16xbf16>
      %c0_78 = arith.constant 0 : index
      %c0_79 = arith.constant 0 : index
      %c0_80 = arith.constant 0 : index
      %146 = vector.load %arg23[%c0_78, %c0_79, %c0_80] : memref<2x8x16xbf16, #tpu.memory_space<vmem>>, vector<2x8x16xbf16>
      tpu.vector_store %arg23[%c0_78, %c0_79, %c0_80], %145 {strides = array<i32>} : memref<2x8x16xbf16, #tpu.memory_space<vmem>>, vector<2x8x16xbf16>,
      %147 = arith.truncf %142 : vector<8x32xf32> to vector<8x32xbf16>
      %148 = vector.shape_cast %147 : vector<8x32xbf16> to vector<8x2x16xbf16>
      %149 = tpu.transpose %148, [1, 0, 2] : vector<8x2x16xbf16> -> vector<2x8x16xbf16>
      %c0_81 = arith.constant 0 : index
      %c0_82 = arith.constant 0 : index
      %c0_83 = arith.constant 0 : index
      %150 = vector.load %arg24[%c0_81, %c0_82, %c0_83] : memref<2x8x16xbf16, #tpu.memory_space<vmem>>, vector<2x8x16xbf16>
      tpu.vector_store %arg24[%c0_81, %c0_82, %c0_83], %149 {strides = array<i32>} : memref<2x8x16xbf16, #tpu.memory_space<vmem>>, vector<2x8x16xbf16>,
    } else {
    }
    %c0 = arith.constant 0 : index
    %c0_1 = arith.constant 0 : index
    %c0_2 = arith.constant 0 : index
    %3 = vector.load %arg2[%c0, %c0_1, %c0_2] : memref<1x8x32xbf16, #tpu.memory_space<vmem>>, vector<1x8x32xbf16>
    %4 = vector.shape_cast %3 : vector<1x8x32xbf16> to vector<8x32xbf16>
    %5 = arith.extf %4 : vector<8x32xbf16> to vector<8x32xf32>
    %c0_3 = arith.constant 0 : index
    %c0_4 = arith.constant 0 : index
    %c0_5 = arith.constant 0 : index
    %6 = vector.load %arg4[%c0_3, %c0_4, %c0_5] : memref<1x8x8xbf16, #tpu.memory_space<vmem>>, vector<1x8x8xbf16>
    %7 = vector.shape_cast %6 : vector<1x8x8xbf16> to vector<8x8xbf16>
    %c0_6 = arith.constant 0 : index
    %c0_7 = arith.constant 0 : index
    %c0_8 = arith.constant 0 : index
    %8 = vector.load %arg5[%c0_6, %c0_7, %c0_8] : memref<1x8x1xf32, #tpu.memory_space<vmem>>, vector<1x8x1xf32>
    %9 = vector.shape_cast %8 : vector<1x8x1xf32> to vector<8x1xf32>
    %c0_9 = arith.constant 0 : index
    %c0_10 = arith.constant 0 : index
    %10 = vector.load %arg6[%c0_9, %c0_10] : memref<32x32xbf16, #tpu.memory_space<vmem>>, vector<32x32xbf16>
    %cst = arith.constant dense<0.000000e+00> : vector<8x32xf32>
    %11 = tpu.matmul %4, %10, %cst {dimension_numbers = #tpu.dot_dimension_numbers<[1], [0], [0], [1], [0, 0, 1, 1], [], []>} : vector<8x32xbf16>, vector<32x32xbf16>, vector<8x32xf32> -> vector<8x32xf32>
    %c0_11 = arith.constant 0 : index
    %c0_12 = arith.constant 0 : index
    %12 = vector.load %arg7[%c0_11, %c0_12] : memref<1x32xf32, #tpu.memory_space<vmem>>, vector<1x32xf32>
    %13 = vector.broadcast %12 : vector<1x32xf32> to vector<8x32xf32>
    %14 = arith.addf %11, %13 : vector<8x32xf32>
    %15 = arith.truncf %14 : vector<8x32xf32> to vector<8x32xbf16>
    %16 = vector.shape_cast %15 : vector<8x32xbf16> to vector<8x2x16xbf16>
    %17 = tpu.transpose %16, [1, 0, 2] : vector<8x2x16xbf16> -> vector<2x8x16xbf16>
    %cst_13 = arith.constant 0xFF800000 : f32
    %18 = vector.broadcast %cst_13 : f32 to vector<2x8x1xf32>
    %cst_14 = arith.constant 0.000000e+00 : f32
    %19 = vector.broadcast %cst_14 : f32 to vector<2x8x1xf32>
    %cst_15 = arith.constant 0.000000e+00 : f32
    %20 = vector.broadcast %cst_15 : f32 to vector<2x8x16xf32>
    %c0_16 = arith.constant 0 : index
    %c0_17 = arith.constant 0 : index
    %c0_18 = arith.constant 0 : index
    %21 = vector.load %arg23[%c0_16, %c0_17, %c0_18] : memref<2x8x16xbf16, #tpu.memory_space<vmem>>, vector<2x8x16xbf16>
    %c0_19 = arith.constant 0 : index
    %c0_20 = arith.constant 0 : index
    %c0_21 = arith.constant 0 : index
    %22 = vector.load %arg24[%c0_19, %c0_20, %c0_21] : memref<2x8x16xbf16, #tpu.memory_space<vmem>>, vector<2x8x16xbf16>
    "tpu.trace_start"() <{level = 10 : i32, message = "hqd,hkd->hqk"}> : () -> ()
    %cst_22 = arith.constant dense<0.000000e+00> : vector<2x8x8xf32>
    %23 = tpu.matmul %17, %21, %cst_22 {dimension_numbers = #tpu.dot_dimension_numbers<[2], [2], [1], [1], [0, 0, 0, 1, 1, 1], [0], [0]>} : vector<2x8x16xbf16>, vector<2x8x16xbf16>, vector<2x8x8xf32> -> vector<2x8x8xf32>
    "tpu.trace_stop"() : () -> ()
    %24 = vector.shape_cast %7 : vector<8x8xbf16> to vector<1x8x8xbf16>
    %cst_23 = arith.constant 5.000000e-01 : bf16
    %25 = vector.broadcast %cst_23 : bf16 to vector<1x8x8xbf16>
    %26 = arith.cmpf ogt, %24, %25 : vector<1x8x8xbf16>
    %cst_24 = arith.constant -1.000000e+10 : f32
    %27 = vector.shape_cast %26 : vector<1x8x8xi1> to vector<1x8x8xi1>
    %28 = vector.broadcast %27 : vector<1x8x8xi1> to vector<2x8x8xi1>
    %29 = vector.broadcast %cst_24 : f32 to vector<2x8x8xf32>
    %30 = arith.select %28, %29, %23 : vector<2x8x8xi1>, vector<2x8x8xf32>
    %cst_25 = arith.constant dense<0xFF800000> : vector<2x8xf32>
    %31 = vector.multi_reduction <maximumf>, %30, %cst_25 [2] : vector<2x8x8xf32> to vector<2x8xf32>
    %32 = vector.shape_cast %31 : vector<2x8xf32> to vector<2x8x1xf32>
    %33 = arith.maximumf %18, %32 : vector<2x8x1xf32>
    %34 = arith.subf %18, %33 : vector<2x8x1xf32>
    %35 = math.exp %34 : vector<2x8x1xf32>
    %36 = vector.broadcast %33 : vector<2x8x1xf32> to vector<2x8x8xf32>
    %37 = arith.subf %30, %36 : vector<2x8x8xf32>
    %38 = math.exp %37 : vector<2x8x8xf32>
    %39 = arith.mulf %35, %19 : vector<2x8x1xf32>
    %cst_26 = arith.constant dense<0.000000e+00> : vector<2x8xf32>
    %40 = vector.multi_reduction <add>, %38, %cst_26 [2] : vector<2x8x8xf32> to vector<2x8xf32>
    %41 = vector.shape_cast %40 : vector<2x8xf32> to vector<2x8x1xf32>
    %42 = arith.addf %39, %41 : vector<2x8x1xf32>
    %43 = vector.broadcast %35 : vector<2x8x1xf32> to vector<2x8x16xf32>
    %44 = arith.mulf %43, %20 : vector<2x8x16xf32>
    %45 = arith.truncf %38 : vector<2x8x8xf32> to vector<2x8x8xbf16>
    "tpu.trace_start"() <{level = 10 : i32, message = "hqk,hkv->hqv"}> : () -> ()
    %cst_27 = arith.constant dense<0.000000e+00> : vector<2x8x16xf32>
    %46 = tpu.matmul %45, %22, %cst_27 {dimension_numbers = #tpu.dot_dimension_numbers<[2], [1], [1], [2], [0, 0, 0, 1, 1, 2], [0], [0]>} : vector<2x8x8xbf16>, vector<2x8x16xbf16>, vector<2x8x16xf32> -> vector<2x8x16xf32>
    "tpu.trace_stop"() : () -> ()
    %47 = arith.addf %44, %46 : vector<2x8x16xf32>
    %48 = tpu.reciprocal %42 {approx = true} : vector<2x8x1xf32> -> vector<2x8x1xf32>
    %49 = vector.broadcast %48 : vector<2x8x1xf32> to vector<2x8x16xf32>
    %50 = arith.mulf %47, %49 : vector<2x8x16xf32>
    %51 = arith.truncf %50 : vector<2x8x16xf32> to vector<2x8x16xbf16>
    %52 = tpu.transpose %51, [1, 0, 2] : vector<2x8x16xbf16> -> vector<8x2x16xbf16>
    %53 = vector.shape_cast %52 : vector<8x2x16xbf16> to vector<8x32xbf16>
    %c0_28 = arith.constant 0 : index
    %c0_29 = arith.constant 0 : index
    %54 = vector.load %arg12[%c0_28, %c0_29] : memref<32x32xbf16, #tpu.memory_space<vmem>>, vector<32x32xbf16>
    %cst_30 = arith.constant dense<0.000000e+00> : vector<8x32xf32>
    %55 = tpu.matmul %53, %54, %cst_30 {dimension_numbers = #tpu.dot_dimension_numbers<[1], [0], [0], [1], [0, 0, 1, 1], [], []>} : vector<8x32xbf16>, vector<32x32xbf16>, vector<8x32xf32> -> vector<8x32xf32>
    %c0_31 = arith.constant 0 : index
    %c0_32 = arith.constant 0 : index
    %56 = vector.load %arg13[%c0_31, %c0_32] : memref<1x32xf32, #tpu.memory_space<vmem>>, vector<1x32xf32>
    %57 = vector.broadcast %56 : vector<1x32xf32> to vector<8x32xf32>
    %58 = arith.addf %55, %57 : vector<8x32xf32>
    %59 = arith.addf %58, %5 : vector<8x32xf32>
    %c0_33 = arith.constant 0 : index
    %c0_34 = arith.constant 0 : index
    %60 = vector.load %arg14[%c0_33, %c0_34] : memref<1x32xf32, #tpu.memory_space<vmem>>, vector<1x32xf32>
    %c0_35 = arith.constant 0 : index
    %c0_36 = arith.constant 0 : index
    %61 = vector.load %arg15[%c0_35, %c0_36] : memref<1x32xf32, #tpu.memory_space<vmem>>, vector<1x32xf32>
    %cst_37 = arith.constant dense<0.000000e+00> : vector<8xf32>
    %62 = vector.multi_reduction <add>, %59, %cst_37 [1] : vector<8x32xf32> to vector<8xf32>
    %63 = vector.shape_cast %62 : vector<8xf32> to vector<8x1xf32>
    %cst_38 = arith.constant 3.200000e+01 : f32
    %64 = vector.broadcast %cst_38 : f32 to vector<8x1xf32>
    %65 = arith.divf %63, %64 : vector<8x1xf32>
    %66 = vector.broadcast %65 : vector<8x1xf32> to vector<8x32xf32>
    %67 = arith.subf %59, %66 : vector<8x32xf32>
    %68 = arith.mulf %67, %67 : vector<8x32xf32>
    %cst_39 = arith.constant dense<0.000000e+00> : vector<8xf32>
    %69 = vector.multi_reduction <add>, %68, %cst_39 [1] : vector<8x32xf32> to vector<8xf32>
    %70 = vector.shape_cast %69 : vector<8xf32> to vector<8x1xf32>
    %cst_40 = arith.constant 3.200000e+01 : f32
    %71 = vector.broadcast %cst_40 : f32 to vector<8x1xf32>
    %72 = arith.divf %70, %71 : vector<8x1xf32>
    %cst_41 = arith.constant 9.99999974E-6 : f32
    %73 = vector.broadcast %cst_41 : f32 to vector<8x1xf32>
    %74 = arith.addf %72, %73 : vector<8x1xf32>
    %75 = math.rsqrt %74 : vector<8x1xf32>
    %76 = vector.broadcast %65 : vector<8x1xf32> to vector<8x32xf32>
    %77 = arith.subf %59, %76 : vector<8x32xf32>
    %78 = vector.broadcast %75 : vector<8x1xf32> to vector<8x32xf32>
    %79 = arith.mulf %77, %78 : vector<8x32xf32>
    %80 = vector.broadcast %60 : vector<1x32xf32> to vector<8x32xf32>
    %81 = arith.mulf %79, %80 : vector<8x32xf32>
    %82 = vector.broadcast %61 : vector<1x32xf32> to vector<8x32xf32>
    %83 = arith.addf %81, %82 : vector<8x32xf32>
    %84 = vector.broadcast %9 : vector<8x1xf32> to vector<8x32xf32>
    %85 = arith.mulf %83, %84 : vector<8x32xf32>
    %86 = arith.truncf %85 : vector<8x32xf32> to vector<8x32xbf16>
    %c0_42 = arith.constant 0 : index
    %c0_43 = arith.constant 0 : index
    %87 = vector.load %arg16[%c0_42, %c0_43] : memref<32x64xbf16, #tpu.memory_space<vmem>>, vector<32x64xbf16>
    %cst_44 = arith.constant dense<0.000000e+00> : vector<8x64xf32>
    %88 = tpu.matmul %86, %87, %cst_44 {dimension_numbers = #tpu.dot_dimension_numbers<[1], [0], [0], [1], [0, 0, 1, 1], [], []>} : vector<8x32xbf16>, vector<32x64xbf16>, vector<8x64xf32> -> vector<8x64xf32>
    %c0_45 = arith.constant 0 : index
    %c0_46 = arith.constant 0 : index
    %89 = vector.load %arg17[%c0_45, %c0_46] : memref<1x64xf32, #tpu.memory_space<vmem>>, vector<1x64xf32>
    %90 = vector.broadcast %89 : vector<1x64xf32> to vector<8x64xf32>
    %91 = arith.addf %88, %90 : vector<8x64xf32>
    %cst_47 = arith.constant 0.000000e+00 : f32
    %92 = vector.broadcast %cst_47 : f32 to vector<8x64xf32>
    %93 = arith.maximumf %91, %92 : vector<8x64xf32>
    %94 = arith.truncf %93 : vector<8x64xf32> to vector<8x64xbf16>
    %c0_48 = arith.constant 0 : index
    %c0_49 = arith.constant 0 : index
    %95 = vector.load %arg18[%c0_48, %c0_49] : memref<64x32xbf16, #tpu.memory_space<vmem>>, vector<64x32xbf16>
    %cst_50 = arith.constant dense<0.000000e+00> : vector<8x32xf32>
    %96 = tpu.matmul %94, %95, %cst_50 {dimension_numbers = #tpu.dot_dimension_numbers<[1], [0], [0], [1], [0, 0, 1, 1], [], []>} : vector<8x64xbf16>, vector<64x32xbf16>, vector<8x32xf32> -> vector<8x32xf32>
    %c0_51 = arith.constant 0 : index
    %c0_52 = arith.constant 0 : index
    %97 = vector.load %arg19[%c0_51, %c0_52] : memref<1x32xf32, #tpu.memory_space<vmem>>, vector<1x32xf32>
    %98 = vector.broadcast %97 : vector<1x32xf32> to vector<8x32xf32>
    %99 = arith.addf %96, %98 : vector<8x32xf32>
    %100 = arith.addf %99, %85 : vector<8x32xf32>
    %c0_53 = arith.constant 0 : index
    %c0_54 = arith.constant 0 : index
    %101 = vector.load %arg20[%c0_53, %c0_54] : memref<1x32xf32, #tpu.memory_space<vmem>>, vector<1x32xf32>
    %c0_55 = arith.constant 0 : index
    %c0_56 = arith.constant 0 : index
    %102 = vector.load %arg21[%c0_55, %c0_56] : memref<1x32xf32, #tpu.memory_space<vmem>>, vector<1x32xf32>
    %cst_57 = arith.constant dense<0.000000e+00> : vector<8xf32>
    %103 = vector.multi_reduction <add>, %100, %cst_57 [1] : vector<8x32xf32> to vector<8xf32>
    %104 = vector.shape_cast %103 : vector<8xf32> to vector<8x1xf32>
    %cst_58 = arith.constant 3.200000e+01 : f32
    %105 = vector.broadcast %cst_58 : f32 to vector<8x1xf32>
    %106 = arith.divf %104, %105 : vector<8x1xf32>
    %107 = vector.broadcast %106 : vector<8x1xf32> to vector<8x32xf32>
    %108 = arith.subf %100, %107 : vector<8x32xf32>
    %109 = arith.mulf %108, %108 : vector<8x32xf32>
    %cst_59 = arith.constant dense<0.000000e+00> : vector<8xf32>
    %110 = vector.multi_reduction <add>, %109, %cst_59 [1] : vector<8x32xf32> to vector<8xf32>
    %111 = vector.shape_cast %110 : vector<8xf32> to vector<8x1xf32>
    %cst_60 = arith.constant 3.200000e+01 : f32
    %112 = vector.broadcast %cst_60 : f32 to vector<8x1xf32>
    %113 = arith.divf %111, %112 : vector<8x1xf32>
    %cst_61 = arith.constant 9.99999974E-6 : f32
    %114 = vector.broadcast %cst_61 : f32 to vector<8x1xf32>
    %115 = arith.addf %113, %114 : vector<8x1xf32>
    %116 = math.rsqrt %115 : vector<8x1xf32>
    %117 = vector.broadcast %106 : vector<8x1xf32> to vector<8x32xf32>
    %118 = arith.subf %100, %117 : vector<8x32xf32>
    %119 = vector.broadcast %116 : vector<8x1xf32> to vector<8x32xf32>
    %120 = arith.mulf %118, %119 : vector<8x32xf32>
    %121 = vector.broadcast %101 : vector<1x32xf32> to vector<8x32xf32>
    %122 = arith.mulf %120, %121 : vector<8x32xf32>
    %123 = vector.broadcast %102 : vector<1x32xf32> to vector<8x32xf32>
    %124 = arith.addf %122, %123 : vector<8x32xf32>
    %125 = vector.broadcast %9 : vector<8x1xf32> to vector<8x32xf32>
    %126 = arith.mulf %124, %125 : vector<8x32xf32>
    %127 = arith.truncf %126 : vector<8x32xf32> to vector<8x32xbf16>
    %c0_62 = arith.constant 0 : index
    %c0_63 = arith.constant 0 : index
    %c0_64 = arith.constant 0 : index
    %128 = vector.load %arg22[%c0_62, %c0_63, %c0_64] : memref<1x8x32xbf16, #tpu.memory_space<vmem>>, vector<1x8x32xbf16>
    %129 = vector.shape_cast %128 : vector<1x8x32xbf16> to vector<8x32xbf16>
    %130 = vector.shape_cast %127 : vector<8x32xbf16> to vector<1x8x32xbf16>
    tpu.vector_store %arg22[%c0_62, %c0_63, %c0_64], %130 {strides = array<i32>} : memref<1x8x32xbf16, #tpu.memory_space<vmem>>, vector<1x8x32xbf16>,
    return
  }
  func.func @transform_0(%arg0: i32, %arg1: i32) -> (i32, i32, i32) {
    %c0_i32 = arith.constant 0 : i32
    %c0_i32_0 = arith.constant 0 : i32
    return %arg0, %arg1, %c0_i32 : i32, i32, i32
  }
  func.func @transform_1(%arg0: i32, %arg1: i32) -> (i32, i32, i32) {
    %c0_i32 = arith.constant 0 : i32
    %c0_i32_0 = arith.constant 0 : i32
    %c0_i32_1 = arith.constant 0 : i32
    return %arg0, %c0_i32, %c0_i32_0 : i32, i32, i32
  }
  func.func @transform_2(%arg0: i32, %arg1: i32) -> (i32, i32, i32) {
    %c0_i32 = arith.constant 0 : i32
    %c0_i32_0 = arith.constant 0 : i32
    return %arg0, %arg1, %c0_i32 : i32, i32, i32
  }
  func.func @transform_3(%arg0: i32, %arg1: i32) -> (i32, i32, i32) {
    %c0_i32 = arith.constant 0 : i32
    %c0_i32_0 = arith.constant 0 : i32
    return %arg0, %arg1, %c0_i32 : i32, i32, i32
  }
  func.func @transform_4(%arg0: i32, %arg1: i32) -> (i32, i32) {
    %c0_i32 = arith.constant 0 : i32
    %c0_i32_0 = arith.constant 0 : i32
    %c0_i32_1 = arith.constant 0 : i32
    return %c0_i32, %c0_i32_0 : i32, i32
  }
  func.func @transform_5(%arg0: i32, %arg1: i32) -> (i32, i32) {
    %c0_i32 = arith.constant 0 : i32
    %c0_i32_0 = arith.constant 0 : i32
    %c0_i32_1 = arith.constant 0 : i32
    return %c0_i32, %c0_i32_0 : i32, i32
  }
  func.func @transform_6(%arg0: i32, %arg1: i32) -> (i32, i32) {
    %c0_i32 = arith.constant 0 : i32
    %c0_i32_0 = arith.constant 0 : i32
    %c0_i32_1 = arith.constant 0 : i32
    return %c0_i32, %c0_i32_0 : i32, i32
  }
  func.func @transform_7(%arg0: i32, %arg1: i32) -> (i32, i32) {
    %c0_i32 = arith.constant 0 : i32
    %c0_i32_0 = arith.constant 0 : i32
    %c0_i32_1 = arith.constant 0 : i32
    return %c0_i32, %c0_i32_0 : i32, i32
  }
  func.func @transform_8(%arg0: i32, %arg1: i32) -> (i32, i32) {
    %c0_i32 = arith.constant 0 : i32
    %c0_i32_0 = arith.constant 0 : i32
    %c0_i32_1 = arith.constant 0 : i32
    return %c0_i32, %c0_i32_0 : i32, i32
  }
  func.func @transform_9(%arg0: i32, %arg1: i32) -> (i32, i32) {
    %c0_i32 = arith.constant 0 : i32
    %c0_i32_0 = arith.constant 0 : i32
    %c0_i32_1 = arith.constant 0 : i32
    return %c0_i32, %c0_i32_0 : i32, i32
  }
  func.func @transform_10(%arg0: i32, %arg1: i32) -> (i32, i32) {
    %c0_i32 = arith.constant 0 : i32
    %c0_i32_0 = arith.constant 0 : i32
    %c0_i32_1 = arith.constant 0 : i32
    return %c0_i32, %c0_i32_0 : i32, i32
  }
  func.func @transform_11(%arg0: i32, %arg1: i32) -> (i32, i32) {
    %c0_i32 = arith.constant 0 : i32
    %c0_i32_0 = arith.constant 0 : i32
    %c0_i32_1 = arith.constant 0 : i32
    return %c0_i32, %c0_i32_0 : i32, i32
  }
  func.func @transform_12(%arg0: i32, %arg1: i32) -> (i32, i32) {
    %c0_i32 = arith.constant 0 : i32
    %c0_i32_0 = arith.constant 0 : i32
    %c0_i32_1 = arith.constant 0 : i32
    return %c0_i32, %c0_i32_0 : i32, i32
  }
  func.func @transform_13(%arg0: i32, %arg1: i32) -> (i32, i32) {
    %c0_i32 = arith.constant 0 : i32
    %c0_i32_0 = arith.constant 0 : i32
    %c0_i32_1 = arith.constant 0 : i32
    return %c0_i32, %c0_i32_0 : i32, i32
  }
  func.func @transform_14(%arg0: i32, %arg1: i32) -> (i32, i32) {
    %c0_i32 = arith.constant 0 : i32
    %c0_i32_0 = arith.constant 0 : i32
    %c0_i32_1 = arith.constant 0 : i32
    return %c0_i32, %c0_i32_0 : i32, i32
  }
  func.func @transform_15(%arg0: i32, %arg1: i32) -> (i32, i32) {
    %c0_i32 = arith.constant 0 : i32
    %c0_i32_0 = arith.constant 0 : i32
    %c0_i32_1 = arith.constant 0 : i32
    return %c0_i32, %c0_i32_0 : i32, i32
  }
  func.func @transform_16(%arg0: i32, %arg1: i32) -> (i32, i32) {
    %c0_i32 = arith.constant 0 : i32
    %c0_i32_0 = arith.constant 0 : i32
    %c0_i32_1 = arith.constant 0 : i32
    return %c0_i32, %c0_i32_0 : i32, i32
  }
  func.func @transform_17(%arg0: i32, %arg1: i32) -> (i32, i32) {
    %c0_i32 = arith.constant 0 : i32
    %c0_i32_0 = arith.constant 0 : i32
    %c0_i32_1 = arith.constant 0 : i32
    return %c0_i32, %c0_i32_0 : i32, i32
  }
  func.func @transform_18(%arg0: i32, %arg1: i32) -> (i32, i32) {
    %c0_i32 = arith.constant 0 : i32
    %c0_i32_0 = arith.constant 0 : i32
    %c0_i32_1 = arith.constant 0 : i32
    return %c0_i32, %c0_i32_0 : i32, i32
  }
  func.func @transform_19(%arg0: i32, %arg1: i32) -> (i32, i32) {
    %c0_i32 = arith.constant 0 : i32
    %c0_i32_0 = arith.constant 0 : i32
    %c0_i32_1 = arith.constant 0 : i32
    return %c0_i32, %c0_i32_0 : i32, i32
  }
  func.func @transform_20(%arg0: i32, %arg1: i32) -> (i32, i32, i32) {
    %c0_i32 = arith.constant 0 : i32
    %c0_i32_0 = arith.constant 0 : i32
    return %arg0, %arg1, %c0_i32 : i32, i32, i32
  }
}

</mosaic_0001>

<bundles_post_ra>
// kernel: tpu_custom_call.1
= control target key start
LH: loop header
LB: loop body
LE: loop exit
PB: predicated region body
PF: predicated region fallthrough
CT: control target
= control target key end

     0   :  { %s3351_s0 = inlined_call_operand.hbm [shape: bf16[2,8,32], index: 0, kind: input, shape index: {}]   ;;  %s3352_s1 = inlined_call_operand.hbm [shape: bf16[2,8,32], index: 1, kind: input, shape index: {}]   ;;  %s3353_s2 = inlined_call_operand.hbm [shape: bf16[2,8,8], index: 2, kind: input, shape index: {}]   ;;  %s3354_s3 = inlined_call_operand.vmem [shape: f32[2,8,1], index: 3, kind: input, shape index: {}]   ;;  %s3355_s4 = inlined_call_operand.vmem [shape: bf16[32,32], index: 4, kind: input, shape index: {}]   ;;  %s3356_s5 = inlined_call_operand.hbm [shape: f32[1,32], index: 5, kind: input, shape index: {}]   ;;  %s3357_s6 = inlined_call_operand.vmem [shape: bf16[32,32], index: 6, kind: input, shape index: {}]   ;;  %s3358_s7 = inlined_call_operand.hbm [shape: f32[1,32], index: 7, kind: input, shape index: {}]   ;;  %s3359_s8 = inlined_call_operand.vmem [shape: bf16[32,32], index: 8, kind: input, shape index: {}]   ;;  %s3360_s9 = inlined_call_operand.vmem [shape: f32[1,32], index: 9, kind: input, shape index: {}]   ;;  %s3361_s10 = inlined_call_operand.vmem [shape: bf16[32,32], index: 10, kind: input, shape index: {}]   ;;  %s3362_s11 = inlined_call_operand.vmem [shape: f32[1,32], index: 11, kind: input, shape index: {}]   ;;  %s3363_s12 = inlined_call_operand.vmem [shape: f32[1,32], index: 12, kind: input, shape index: {}]   ;;  %s3364_s13 = inlined_call_operand.vmem [shape: f32[1,32], index: 13, kind: input, shape index: {}]   ;;  %s3365_s14 = inlined_call_operand.vmem [shape: bf16[32,64], index: 14, kind: input, shape index: {}]   ;;  %s3366_s15 = inlined_call_operand.vmem [shape: f32[1,64], index: 15, kind: input, shape index: {}]   ;;  %s3367_s16 = inlined_call_operand.vmem [shape: bf16[64,32], index: 16, kind: input, shape index: {}]   ;;  %s3368_s17 = inlined_call_operand.vmem [shape: f32[1,32], index: 17, kind: input, shape index: {}]   ;;  %s3369_s18 = inlined_call_operand.vmem [shape: f32[1,32], index: 18, kind: input, shape index: {}]   ;;  %s3370_s19 = inlined_call_operand.vmem [shape: f32[1,32], index: 19, kind: input, shape index: {}]   ;;  %s3371_s20 = inlined_call_operand.hbm [shape: bf16[2,8,32], index: 20, kind: output, shape index: {}]  }
   0x1   :  { %3393 = sst [smem:[#allocation26_spill]] %s3351_s0 }
   0x2   :  { %3394 = sst [smem:[#allocation27_spill]] %s3352_s1 }
   0x3   :  { %3395 = sst [smem:[#allocation28_spill]] %s3353_s2 }
   0x4   :  { %3396 = sst [smem:[#allocation29_spill]] %s3354_s3 }
   0x5   :  { %3397 = sst [smem:[#allocation30_spill]] %s3355_s4 }
   0x6   :  { %3398 = sst [smem:[#allocation31_spill]] %s3356_s5 }
   0x7   :  { %3399 = sst [smem:[#allocation32_spill]] %s3363_s12 }
   0x8   :  { %3400 = sst [smem:[#allocation33_spill]] %s3364_s13 }
   0x9   :  { %3401 = sst [smem:[#allocation34_spill]] %s3365_s14 }
   0xa   :  { %3402 = sst [smem:[#allocation35_spill]] %s3366_s15 }
   0xb   :  { %3403 = sst [smem:[#allocation36_spill]] %s3367_s16 }
   0xc   :  { %3404 = sst [smem:[#allocation37_spill]] %s3368_s17 }
   0xd   :  { %3405 = sst [smem:[#allocation38_spill]] %s3369_s18 }
   0xe   :  { %3406 = sst [smem:[#allocation39_spill]] %s3370_s19 }
   0xf   :  { %3407 = sst [smem:[#allocation40_spill]] %s3371_s20 }
  0x10   :  { %25 = vsyncpa [#allocation5], 0 }
  0x11   :  { %27 = vsyncpa [#allocation5 + $0x1], 0 }
  0x12   :  { %28 = vsyncpa [#allocation8], 0 }
  0x13   :  { %30 = vsyncpa [#allocation8 + $0x1], 0 }
  0x14   :  { %31 = vsyncpa [#allocation11], 0 }
  0x15   :  { %32 = vsyncpa [#allocation6], 0 }
  0x16   :  { %34 = vsyncpa [#allocation6 + $0x1], 0  ;;  %s2900_s1 = smov 0   ;;  %s2902_s22 = smov 0  }
  0x17   :  { %s2904_s23 = smov 0   ;;  %s2906_s24 = smov 0  }
  0x18   :  { %s2908_s2 = smov 0   ;;  %s2910_s25 = smov 0  }
  0x19 LB: > { %3408 = sst [smem:[#allocation18_spill]] %s2760_s1  ;;  %s2931_s3 = sadd.s32 4294967295, %s2780_s25   ;;  %s2780_s25 = sphi %s2910_s25, %s40_s25   ;;  %s2776_s2 = sphi %s2908_s2, %s3457_s2   ;;  %s2772_s24 = sphi %s2906_s24, %s3456_s24   ;;  %s2768_s23 = sphi %s2904_s23, %s3460_s23   ;;  %s2764_s22 = sphi %s2902_s22, %s3459_s22   ;;  %s2760_s1 = sphi %s2900_s1, %s3458_s1  }
  0x1a   : > { %3409 = sst [smem:[#allocation19_spill]] %s2772_s24  ;;  %s2263_s26 = sadd.s32 4294967294, %s2780_s25  }
  0x1b   : > { %3410 = sst [smem:[#allocation20_spill]] %s2776_s2  ;;  %p74_p0 = scmp.ne.s32.totalorder %s2764_s22, %s2760_s1 }
  0x1c   : > { %3411 = sst [smem:[#allocation21_spill]] %s2780_s25  ;;  %p3375_p1 = scmp.eq.s32.totalorder %s2931_s3, 0 }
  0x1d   : > { %p518_p2 = scmp.eq.s32.totalorder %s2931_s3, 1  ;;  %p524_p3 = scmp.eq.s32.totalorder %s2263_s26, 1 }
  0x1e   : > { %p2940_p4 = por %p3375_p1, %p74_p0  ;;  %p2264_p5 = scmp.ge.s32.totalorder %s2780_s25, 1 }
  0x1f   : > { %p2945_p6 = por %p524_p3, %p74_p0  ;;  %p531_p7 = scmp.lt.s32.totalorder %s2780_s25, 3 }
  0x20   : > { %s3412_s27 = scalar_select %p2940_p4, 1, 0 }
  0x21   : > { %s3413_s28 = scalar_select %p2945_p6, 1, 0 }
  0x22   : > { %p2950_p8 = pnand %p2264_p5, %p531_p7  ;;  %s2782_s29 = smov [#allocation10]  }
  0x23   : > { %3414 = sst [smem:[#allocation22_spill]] %s3413_s28  ;;  %s547_s30 = sshll.u32 %s2782_s29, 4  ;;  %s548_s30 = int_to_ptr.vmem [resolvable:$true] %s547_s30 }
  0x24   : > { %s3415_s4 = scalar_select %p2950_p8, 1, 0 }
  0x25   : > { %p2440_p10 = pneg %p2950_p8  ;;  %s52_s21 = sadd.s32 1, %s2776_s2 }
  0x26   : > { %s61_s26 = sadd.s32 1, %s2768_s23  ;;  %p54_p12 = scmp.ge.s32.totalorder %s52_s21, 2 }
  0x27   : > { %p2959_p11 = pnand %p2440_p10, %p3375_p1  ;;  %s2567_s28 = scalar_lea.vmem %s548_s30, 16 }
  0x28   : > { %p2568_p0 = scmp.ne.s32.totalorder %s548_s30, %s2567_s28  ;;  %s2574_s29 = scalar_lea.vmem %s548_s30, 32 }
  0x29   : > { %p3385_p13 = pneg %p2959_p11  ;;  %p2575_p7 = scmp.lt.s32.totalorder %s548_s30, %s548_s30 }
  0x2a   : > { %p2576_p9 = scmp.lt.s32.totalorder %s2574_s29, %s2567_s28 }
  0x2b   : > { %p2570_p3 = pnand %p2568_p0, %p3385_p13 }
  0x2c   : > { %p2577_p10 = por %p2576_p9, %p2575_p7 }
  0x2d   : > { %p2571_p5 = pneg %p2570_p3 }
  0x2f   : > { %p2578_p1 = pnand %p2577_p10, %p2571_p5 }
  0x31   : > { %2581 = shalt.err (!%p2578_p1)
}
  0x32   : > { %s3417_s5 = sld [smem:[#allocation31_spill]]  ;;  %s3462_s21 = smov (%p54_p12, %s52_s21), 0 }
  0x33   : > { %3418 = sst [smem:[#allocation23_spill]] %s3462_s21  ;;  %p68_p1 = scmp.ne.s32.totalorder %s2768_s23, %s2764_s22 }
  0x34   : > { %p69_p9 = scmp.eq.s32.totalorder %s2780_s25, 0  ;;  %s56_s28 = ssub.s32 %s2776_s2, %s3462_s21 }
  0x35   : > { %p2463_p0 = scmp.lt.s32.totalorder %s2780_s25, 2  ;;  %p59_p3 = scmp.eq.s32.totalorder %s56_s28, 0 }
  0x36   : > { %p70_p5 = por %p69_p9, %p68_p1  ;;  %p2985_p7 = por %p518_p2, %p68_p1 }
  0x37   : > { %s3381_s1 = sand.u32 1, %s2768_s23   ;;  %s627_s28 = sand.u32 1, %s2780_s25  }
  0x38   : > { %2443 = dma.hbm_to_vmem [thread:$0]  (!%p2959_p11), %s3417_s5, 16, %s548_s30, [#allocation11]  }
  0x39   : > { %s3419_s20 = scalar_select %p2985_p7, 1, 0 }
  0x3a   : > { %s2991_s29 = scalar_select %p59_p3, %s2768_s23, %s61_s26  }
  0x3b   : > { %3420 = sst [smem:[#allocation24_spill]] %s3419_s20  ;;  %s2995_s19 = sshll.u32 %s3381_s1, 2 }
  0x3c   : > { %3421 = sst [smem:[#allocation25_spill]] %s2991_s29  ;;  %s2998_s30 = sshll.u32 %s2776_s2, 6 }
  0x3d   : > { %p3000_p12 = pnand %p2463_p0, %p70_p5  ;;  %s3423_s20 = sld [smem:[#allocation27_spill]] }
  0x3e   : > { %s631_s26 = scalar_lea.vmem [#allocation7], %s2995_s19  ;;  %s2783_s1 = smov [#allocation12]  }
  0x3f   : > { %s638_s29 = sshll.u32 %s631_s26, 4  ;;  %s561_s15 = sshll.u32 %s2783_s1, 4  ;;  %s639_s29 = int_to_ptr.vmem [resolvable:$true] %s638_s29  ;;  %s562_s15 = int_to_ptr.vmem [resolvable:$true] %s561_s15 }
  0x40   : > { %s3010_s13 = scalar_lea.sflag [#allocation8], %s627_s28  ;;  %p3386_p2 = pneg %p3000_p12 }
  0x41   : > { %s2595_s2 = scalar_lea.vmem %s639_s29, 64  ;;  %s2784_s25 = smov [#allocation7]  }
  0x42   : > { %p2596_p10 = scmp.ne.s32.totalorder %s639_s29, %s2595_s2  ;;  %s2600_s12 = sshll.u32 %s2784_s25, 4  ;;  %s2601_s12 = int_to_ptr.vmem [resolvable:$false] %s2600_s12 }
  0x43   : > { %s636_s17 = scalar_lea.hbm %s3423_s20, %s2998_s30  ;;  %s2602_s18 = scalar_lea.vmem %s2601_s12, 128 }
  0x44   : > { %p2598_p1 = pnand %p2596_p10, %p3386_p2  ;;  %p2603_p0 = scmp.lt.s32.totalorder %s639_s29, %s2601_s12 }
  0x45   : > { %p2604_p3 = scmp.lt.s32.totalorder %s2602_s18, %s2595_s2 }
  0x46   : > { %p2599_p9 = pneg %p2598_p1 }
  0x47   : > { %p2605_p5 = por %p2604_p3, %p2603_p0 }
  0x49   : > { %p2606_p13 = pnand %p2605_p5, %p2599_p9 }
  0x4b   : > { %2609 = shalt.err (!%p2606_p13)
}
  0x4c   : > { %2453 = dma.hbm_to_vmem [thread:$0]  (!%p3000_p12), %s636_s17, 64, %s639_s29, %s3010_s13  }
  0x4d   : > { %s2621_s21 = scalar_lea.vmem %s562_s15, 16  ;;  %p3424_p10 = pneg %p2959_p11 }
  0x4e   : > { %p2622_p6 = scmp.ne.s32.totalorder %s562_s15, %s2621_s21  ;;  %s2628_s25 = scalar_lea.vmem %s562_s15, 32 }
  0x4f   : > { %p2629_p7 = scmp.lt.s32.totalorder %s562_s15, %s562_s15  ;;  %p2630_p4 = scmp.lt.s32.totalorder %s2628_s25, %s2621_s21 }
  0x50   : > { %p2624_p1 = pnand %p2622_p6, %p3424_p10 }
  0x51   : > { %p2631_p8 = por %p2630_p4, %p2629_p7 }
  0x52   : > { %p2625_p2 = pneg %p2624_p1 }
  0x54   : > { %p2632_p0 = pnand %p2631_p8, %p2625_p2 }
  0x56   : > { %2635 = shalt.err (!%p2632_p0)
}
  0x57   : > { %2446 = dma.hbm_to_vmem [thread:$0]  (!%p2959_p11), %s3358_s7, 16, %s562_s15, [#allocation11]  }
  0x58   : > { %s3425_s1 = sld [smem:[#allocation26_spill]]  ;;  %s612_s28 = scalar_lea.vmem [#allocation4], %s2995_s19 }
  0x59   : > { %s620_s26 = sshll.u32 %s612_s28, 4  ;;  %s3426_s25 = sld [smem:[#allocation28_spill]]  ;;  %s621_s26 = int_to_ptr.vmem [resolvable:$true] %s620_s26 }
  0x5a   : > { %s3428_s14 = sand.u32 1, %s2768_s23   ;;  %s2649_s12 = scalar_lea.vmem %s621_s26, 64 }
  0x5b   : > { %s609_s24 = scalar_lea.sflag [#allocation5], %s3428_s14  ;;  %p2650_p4 = scmp.ne.s32.totalorder %s621_s26, %s2649_s12 }
  0x5c   : > { %p3429_p6 = pneg %p3000_p12  ;;  %s2785_s15 = smov [#allocation4]  }
  0x5d   : > { %s2654_s2 = sshll.u32 %s2785_s15, 4  ;;  %s2655_s2 = int_to_ptr.vmem [resolvable:$false] %s2654_s2 }
  0x5e   : > { %s618_s29 = scalar_lea.hbm %s3425_s1, %s2998_s30  ;;  %p2652_p8 = pnand %p2650_p4, %p3429_p6 }
  0x5f   : > { %s655_s0 = scalar_lea.hbm %s3426_s25, %s2998_s30  ;;  %s2656_s17 = scalar_lea.vmem %s2655_s2, 128 }
  0x60   : > { %p2653_p13 = pneg %p2652_p8  ;;  %p2657_p11 = scmp.lt.s32.totalorder %s621_s26, %s2655_s2 }
  0x61   : > { %p2658_p7 = scmp.lt.s32.totalorder %s2656_s17, %s2649_s12 }
  0x63   : > { %p2659_p2 = por %p2658_p7, %p2657_p11 }
  0x65   : > { %p2660_p9 = pnand %p2659_p2, %p2653_p13 }
  0x67   : > { %2663 = shalt.err (!%p2660_p9)
}
  0x68   : > { %2450 = dma.hbm_to_vmem [thread:$0]  (!%p3000_p12), %s618_s29, 64, %s621_s26, %s609_s24  }
  0x69   : > { %s649_s14 = scalar_lea.vmem [#allocation9], %s2995_s19  ;;  %p3430_p5 = pmov %p3429_p6 }
  0x6a   : > { %s657_s20 = sshll.u32 %s649_s14, 4  ;;  %s2786_s28 = smov [#allocation9]   ;;  %s658_s20 = int_to_ptr.vmem [resolvable:$true] %s657_s20 }
  0x6b   : > { %s2677_s1 = scalar_lea.vmem %s658_s20, 64  ;;  %s2682_s18 = sshll.u32 %s2786_s28, 4  ;;  %s2683_s18 = int_to_ptr.vmem [resolvable:$false] %s2682_s18 }
  0x6c   : > { %p2678_p3 = scmp.ne.s32.totalorder %s658_s20, %s2677_s1  ;;  %s2684_s21 = scalar_lea.vmem %s2683_s18, 128 }
  0x6d   : > { %p2685_p0 = scmp.lt.s32.totalorder %s658_s20, %s2683_s18  ;;  %p2686_p4 = scmp.lt.s32.totalorder %s2684_s21, %s2677_s1 }
  0x6e   : > { %p2680_p10 = pnand %p2678_p3, %p3430_p5 }
  0x6f   : > { %p2687_p6 = por %p2686_p4, %p2685_p0 }
  0x70   : > { %p2681_p1 = pneg %p2680_p10 }
  0x72   : > { %p2688_p8 = pnand %p2687_p6, %p2681_p1 }
  0x74   : > { %2691 = shalt.err (!%p2688_p8)
}
  0x75   : > { %2456 = dma.hbm_to_vmem [thread:$0]  (!%p3000_p12), %s655_s0, 64, %s658_s20, %s3010_s13  }
  0x76   : > { %p3431_p13 = scmp.ne.s32.totalorder %s3415_s4, 0 }
  0x77   : > { %s3059_s29 = sand.u32 (!%p3431_p13), 1, %s2764_s22   ;;  %p3432_p11 = scmp.ne.s32.totalorder (!%p3431_p13), %s3412_s27, 0 }
  0x78   : > { %676 = sbr.rel (%p3431_p13) target bundleno = 2416 (0x970), region = 100  ;;  %s3062_s26 = sshll.u32 (!%p3431_p13), %s3059_s29, 2 }
  0x79   : > { %s679_s5 = scalar_lea.sflag (!%p3431_p13), [#allocation5], %s3059_s29  ;;  %s682_s25 = scalar_lea.vmem (!%p3431_p13), [#allocation4], %s3062_s26 }
  0x7d   : > { %2743 = dma.done.wait (%p3432_p11), %s679_s5, 64  }
  0x7e   : > { %2745 = vsyncadd (%p3432_p11), %s679_s5, 4294967232  ;;  %s687_s13 = sand.u32 1, %s2931_s3   ;;  %s691_s30 = scalar_lea.vmem [#allocation7], %s3062_s26 }
  0x7f   : > { %s688_s4 = scalar_lea.sflag [#allocation8], %s687_s13 }
  0x80   : > { %2747 = dma.done.wait (%p3432_p11), %s688_s4, 128  }
  0x81   : > { %2749 = vsyncadd (%p3432_p11), %s688_s4, 4294967168  ;;  %s700_s0 = scalar_lea.vmem [#allocation9], %s3062_s26  ;;  %p3433_p12 = scmp.eq.s32.totalorder %s2931_s3, 0 }
  0x83   : > { %2751 = dma.done.wait (%p3433_p12), [#allocation11], 32   ;;  %p3434_p7 = pmov %p3433_p12 }
  0x84   : > { %v2787_v0 = vmov 0.0   ;;  %vm2788_vm0 = vmmov 0   ;;  %v2526_v1 = vld [vmem:[%s3357_s6 + $0x8] sm:$0xff]   ;;  %v2527_v2 = vld [vmem:[%s3357_s6] sm:$0xff]   ;;  %v797_v3 = vld [vmem:[%s691_s30] sm:$0xf]  ;;  %v935_v33 = vlaneseq }
  0x85   : > { %2753 = vsyncadd (%p3434_p7), [#allocation11], 4294967264  ;;  %2348 = vmatprep.subr.bf16.mxu0 %v2787_v0  ;;  %2352 = vmatprep.mubr.msk.bf16.mxu0 %vm2788_vm0, %v2787_v0  ;;  %v2530_v4 = vld [vmem:[%s3359_s8 + $0x8] sm:$0xff]   ;;  %vm821_vm1 = vcmask 261120   ;;  %s3435_s1 = sld [smem:[#allocation30_spill]]  ;;  %v2531_v6 = vld [vmem:[%s3359_s8] sm:$0xff]  }
  0x86   : > { %2356 = vmatprep.subr.bf16.mxu1 %v2787_v0  ;;  %2360 = vmatprep.mubr.msk.bf16.mxu1 %vm2788_vm0, %v2787_v0  ;;  %v3115_v8 = vld [vmem:[%s682_s25] sm:$0xf]  ;;  %v2789_v9 = vmov 0   ;;  %v2282_v10 = vld [vmem:[#allocation12] ss:$0 sm:$0xff]  ;;  %s2790_s5 = smov 112  }
  0x87   : > { %2349 = vmatpush3.bf16.msra.mxu0 %v2526_v1  ;;  %2357 = vmatpush3.bf16.msra.mxu1 %v2530_v4  ;;  %v2290_v17 = vld [vmem:[#allocation10] ss:$0 sm:$0xff]  ;;  %v2286_v24 = vld [vmem:[%s3360_s9] ss:$0 sm:$0xff]  ;;  %v2791_v31 = vmov 1983009808  }
  0x88   : > { %2350 = vmatprep.subr.bf16.mxu0 %v2787_v0  ;;  %2358 = vmatprep.subr.bf16.mxu1 %v2787_v0  ;;  %v933_v32 = vunpack.c.l.s4 %v2791_v31  ;;  %v936_v35 = vshrl.u32 %v935_v33, 7  ;;  %v2792_v36 = vmov 1934713408   ;;  %vm1069_vm2 = vcmask 125952   ;;  %s2793_s12 = smov 16   ;;  %s3437_s2 = sld [smem:[#allocation19_spill]] }
  0x89   : > { %2524 = vset.pattern.permute.xlu1 %v2789_v9  ;;  %2525 = vset.pattern.permute.xlu0 %v2789_v9  ;;  %v941_v37 = vunpack.c.l.s4 %v2792_v36  ;;  %vm1429_vm3 = vcmask 130048   ;;  %vm1564_vm4 = vcmask 1043456   ;;  %vm1530_vm7 = vcmask 64512   ;;  %s3438_s18 = sld [smem:[#allocation29_spill]]  ;;  %s781_s19 = scalar_lea.vmem [#allocation13], %s3062_s26 }
  0x8a   : > { %v934_v34 = vunpack.c.0.s8 %v933_v32  ;;  %s3443_s4 = sld [smem:[#allocation35_spill]]  ;;  %vm2011_vm8 = vcmask 523264   ;;  %s2104_s24 = sshll.u32 %s781_s19, 4  ;;  %vm2087_vm9 = vcmask 257024   ;;  %s2105_s24 = int_to_ptr.vmem [resolvable:$true] %s2104_s24 }
  0x8b   : > { %2351 = vmatpush3.bf16.msra.mxu0 %v2527_v2  ;;  %s3436_s28 = smov %s3435_s1  ;;  %v2528_v5 = vld [vmem:[%s3435_s1 + $0x8] sm:$0xff]   ;;  %2359 = vmatpush3.bf16.msra.mxu1 %v2531_v6  ;;  %v942_v39 = vunpack.c.0.s8 %v941_v37  ;;  %s3442_s1 = sld [smem:[#allocation33_spill]] }
  0x8c   : > { %2364 = vmatprep.subr.bf16.mxu0 %v2787_v0  ;;  %v2529_v7 = vld [vmem:[%s3436_s28] sm:$0xff]   ;;  %2372 = vmatprep.subr.bf16.mxu1 %v2787_v0  ;;  %v3133_v38 = vsub.s32 %v934_v34, %v936_v35  ;;  %s2090_s27 = scalar_lea.sflag [#allocation6], %s3059_s29  ;;  %s2794_s15 = smov [#allocation13]  }
  0x8d   : > { %v3136_v41 = vsub.s32 %v942_v39, %v936_v35  ;;  %s2696_s3 = sshll.u32 %s2794_s15, 4  ;;  %s2697_s3 = int_to_ptr.vmem [resolvable:$false] %s2696_s3 }
  0x8e   : > { %2353 = vmatmul.mubr.msk.bf16.vlgmr.msra.gmra.mxu0 %vm821_vm1, %v797_v3  ;;  %2361 = vmatmul.mubr.msk.bf16.vlgmr.msra.gmra.mxu1 %vm821_vm1, %v797_v3  ;;  %p782_p2 = scmp.lt.s32.totalorder %s3437_s2, 1  ;;  %s2698_s26 = scalar_lea.vmem %s2697_s3, 128 }
  0x8f   : > { %2365 = vmatpush3.bf16.msra.mxu0 %v2528_v5  ;;  %2368 = vmatprep.mubr.msk.bf16.mxu0 %vm2788_vm0, %v2787_v0  ;;  %p2699_p1 = scmp.lt.s32.totalorder %s2105_s24, %s2697_s3 }
  0x90   : > { %2366 = vmatprep.subr.bf16.mxu0 %v2787_v0  ;;  %2374 = vmatprep.mubr.msk.bf16.mxu1 %vm2788_vm0, %v2787_v0  ;;  %s783_s17 = scalar_select %p782_p2, %s3437_s2, 1 }
  0x92   : > { %s2281_s14 = sshll.u32 %s783_s17, 3  ;;  %s3441_s17 = sld [smem:[#allocation32_spill]] }
  0x93   : > { %2367 = vmatpush3.bf16.msra.mxu0 %v2529_v7  ;;  %s788_s21 = scalar_lea.vmem %s3438_s18, %s2281_s14  ;;  %s3447_s18 = sld [smem:[#allocation24_spill]] }
  0x94   : > { %2378 = vmatprep.subr.bf16.mxu0 %v2787_v0 }
  0x96   : > { %2369 = vmatmul.mubr.msk.bf16.vlgmr.msra.gmra.mxu0 %vm821_vm1, %v3115_v8 }
  0x97   : > { %2380 = vmatprep.mubr.msk.bf16.mxu0 %vm2788_vm0, %v2787_v0 }
  0x99   : > { %p3449_p3 = scmp.ne.s32.totalorder %s3447_s18, 0 }
 0x14e   : > { %v859_v11 = vpop.f32.mrf.mxu0  ;;  %v922_v25 = vpop.f32.mrf.mxu1 }
 0x14f   : > { %v860_v12 = vadd.f32 %v2282_v10, %v859_v11  ;;  %v923_v26 = vadd.f32 %v2286_v24, %v922_v25 }
 0x150   : > { %v2354_v13 = vpop.f32.mrf.mxu0  ;;  %v2362_v27 = vpop.f32.mrf.mxu1 }
 0x151   : > { %v928_v14 = vpack.c.bf16 %v860_v12, %v860_v12  ;;  %v3130_v28 = vpack.c.bf16 %v923_v26, %v923_v26 }
 0x152   : > { %v862_v15 = vpop.f32.mrf.mxu0  ;;  %v925_v29 = vpop.f32.mrf.mxu1 }
 0x153   : > { %930 = vrot.lane.b32.xlu0 %v928_v14, %s2790_s5  ;;  %1074 = vrot.lane.b32.xlu1 %v3130_v28, %s2790_s5  ;;  %v938_v40 = vrot.slane %v928_v14, %v3133_v38 }
 0x154   : > { %v2355_v16 = vpop.f32.mrf.mxu0  ;;  %v2363_v30 = vpop.f32.mrf.mxu1 }
 0x155   : > { %v939_v42 = vcombine.high %v938_v40, %v2789_v9  ;;  %v946_v43 = vrot.slane %v938_v40, %v3136_v41 }
 0x156   : > { %v1280_v18 = vpop.f32.mrf.mxu0 }
 0x157   : > { %v1281_v19 = vadd.f32 %v2290_v17, %v1280_v18  ;;  %v953_v44 = vrot.slane %v939_v42, %v3136_v41  ;;  %v954_v48 = vcombine.high %v946_v43, %v2789_v9  ;;  %v985_v56 = vshrl.u32 %v946_v43, 16 }
 0x158   : > { %v2370_v20 = vpop.f32.mrf.mxu0 }
 0x159   : > { %v1286_v21 = vpack.c.bf16 %v1281_v19, %v1281_v19  ;;  %v955_v49 = vcombine.high %v953_v44, %v2789_v9  ;;  %v993_v57 = vshrl.u32 %v954_v48, 16  ;;  %v1001_v58 = vshrl.u32 %v953_v44, 16 }
 0x15a   : > { %v1283_v22 = vpop.f32.mrf.mxu0 }
 0x15b   : > { %1288 = vrot.lane.b32.xlu0 %v1286_v21, %s2790_s5  ;;  %v1296_v45 = vrot.slane %v1286_v21, %v3133_v38  ;;  %v1009_v60 = vshrl.u32 %v955_v49, 16  ;;  %s3439_s5 = sld [smem:[#allocation34_spill]] }
 0x15c   : > { %v2371_v23 = vpop.f32.mrf.mxu0 }
 0x15d   : > { %v1297_v50 = vcombine.high %v1296_v45, %v2789_v9  ;;  %v3149_v53 = vrot.slane %v1296_v45, %v3136_v41 }
 0x15f   : > { %v1311_v61 = vrot.slane %v1297_v50, %v3136_v41  ;;  %v1312_v1 = vcombine.high %v3149_v53, %v2789_v9  ;;  %v1343_v27 = vshrl.u32 %v3149_v53, 16 }
 0x161   : > { %v1313_v20 = vcombine.high %v1311_v61, %v2789_v9  ;;  %v1351_v29 = vshrl.u32 %v1312_v1, 16  ;;  %v1359_v35 = vshrl.u32 %v1311_v61, 16 }
 0x163   : > { %v1367_v36 = vshrl.u32 %v1313_v20, 16 }
 0x1c5   : > { %v931_v46 = vpop.permute.xlu0 %930 }
 0x1c6   : > { %v963_v47 = vrot.slane %v931_v46, %v3133_v38 }
 0x1c8   : > { %v964_v51 = vcombine.high %v963_v47, %v2789_v9  ;;  %v971_v52 = vrot.slane %v963_v47, %v3136_v41 }
 0x1ca   : > { %v978_v54 = vrot.slane %v964_v51, %v3136_v41  ;;  %v979_v55 = vcombine.high %v971_v52, %v2789_v9  ;;  %v986_v59 = vshrl.u32 %v971_v52, 16  ;;  %v983_v2 = vpack.i.b16 %v971_v52, %v946_v43 }
 0x1cc   : > { %v980_v62 = vcombine.high %v978_v54, %v2789_v9  ;;  %v994_v63 = vshrl.u32 %v979_v55, 16  ;;  %v999_v3 = vpack.i.b16 %v978_v54, %v953_v44  ;;  %v1002_v4 = vshrl.u32 %v978_v54, 16 }
 0x1cd   : > { %v1289_v5 = vpop.permute.xlu0 %1288  ;;  %v991_v6 = vpack.i.b16 %v979_v55, %v954_v48  ;;  %v987_v12 = vpack.i.b16 %v986_v59, %v985_v56 }
 0x1ce   : > { %v1007_v7 = vpack.i.b16 %v980_v62, %v955_v49  ;;  %v1010_v10 = vshrl.u32 %v980_v62, 16  ;;  %v1321_v11 = vrot.slane %v1289_v5, %v3133_v38  ;;  %v995_v13 = vpack.i.b16 %v994_v63, %v993_v57 }
 0x1cf   : > { %v1003_v14 = vpack.i.b16 %v1002_v4, %v1001_v58  ;;  %v1013_v15 = vcombine.low %v983_v2, %v999_v3  ;;  %v1082_v62 = vrot.slane %v3130_v28, %v3133_v38 }
 0x1d0   : > { %v1011_v16 = vpack.i.b16 %v1010_v10, %v1009_v60  ;;  %v1021_v17 = vcombine.low %v991_v6, %v1007_v7  ;;  %v1322_v18 = vcombine.high %v1321_v11, %v2789_v9  ;;  %v1329_v19 = vrot.slane %v1321_v11, %v3136_v41 }
 0x1d1   : > { %v1020_v21 = vrot.slane %v1013_v15, %v3133_v38  ;;  %v1037_v22 = vcombine.low %v987_v12, %v1003_v14  ;;  %v1083_v3 = vcombine.high %v1082_v62, %v2789_v9  ;;  %v1090_v28 = vrot.slane %v1082_v62, %v3136_v41  ;;  %v1075_v15 = vpop.permute.xlu1 %1074 }
 0x1d2   : > { %v1028_v23 = vrot.slane %v1021_v17, %v3133_v38  ;;  %v1045_v24 = vcombine.low %v995_v13, %v1011_v16  ;;  %v1336_v25 = vrot.slane %v1322_v18, %v3136_v41  ;;  %v1337_v26 = vcombine.high %v1329_v19, %v2789_v9 }
 0x1d3   : > { %v1044_v30 = vrot.slane %v1037_v22, %v3133_v38  ;;  %v1344_v34 = vshrl.u32 %v1329_v19, 16  ;;  %v1341_v54 = vpack.i.b16 %v1329_v19, %v3149_v53  ;;  %v1097_v7 = vrot.slane %v1083_v3, %v3136_v41 }
 0x1d4   : > { %v1029_v31 = vcombine.low %v1020_v21, %v1028_v23  ;;  %v1052_v32 = vrot.slane %v1045_v24, %v3133_v38  ;;  %v1338_v33 = vcombine.high %v1336_v25, %v2789_v9  ;;  %v1352_v37 = vshrl.u32 %v1337_v26, 16 }
 0x1d5   : > { %v1360_v39 = vshrl.u32 %v1336_v25, 16  ;;  %v1349_v45 = vpack.i.b16 %v1337_v26, %v1312_v1  ;;  %v1357_v46 = vpack.i.b16 %v1336_v25, %v1311_v61  ;;  %v1345_v49 = vpack.i.b16 %v1344_v34, %v1343_v27 }
 0x1d6   : > { %v1036_v40 = vrot.slane %v1029_v31, %v3136_v41  ;;  %v1053_v42 = vcombine.low %v1044_v30, %v1052_v32  ;;  %v1365_v43 = vpack.i.b16 %v1338_v33, %v1313_v20  ;;  %v1368_v44 = vshrl.u32 %v1338_v33, 16 }
 0x1d7   : > { %v1361_v47 = vpack.i.b16 %v1360_v39, %v1359_v35  ;;  %v1353_v50 = vpack.i.b16 %v1352_v37, %v1351_v29  ;;  %v1371_v60 = vcombine.low %v1341_v54, %v1357_v46  ;;  %v1098_v14 = vcombine.high %v1090_v28, %v2789_v9 }
 0x1d8   : > { %v1060_v48 = vrot.slane %v1053_v42, %v3136_v41  ;;  %v1369_v51 = vpack.i.b16 %v1368_v44, %v1367_v36  ;;  %v1065_v52 = vshrl.u32 %v1036_v40, 16  ;;  %v1379_v55 = vcombine.low %v1349_v45, %v1365_v43 }
 0x1d9   : > { %v1395_v58 = vcombine.low %v1345_v49, %v1361_v47  ;;  %v1378_v2 = vrot.slane %v1371_v60, %v3133_v38  ;;  %v1107_v17 = vrot.slane %v1075_v15, %v3133_v38  ;;  %v1099_v18 = vcombine.high %v1097_v7, %v2789_v9 }
 0x1da   : > { %v1063_v56 = vpack.i.b16 %v1060_v48, %v1036_v40  ;;  %v1066_v57 = vshrl.u32 %v1060_v48, 16  ;;  %v1403_v59 = vcombine.low %v1353_v50, %v1369_v51  ;;  %v1386_v1 = vrot.slane %v1379_v55, %v3133_v38 }
 0x1db   : > { %v1402_v53 = vrot.slane %v1395_v58, %v3133_v38  ;;  %v1108_v20 = vcombine.high %v1107_v17, %v2789_v9  ;;  %v1115_v21 = vrot.slane %v1107_v17, %v3136_v41  ;;  %v1129_v23 = vshrl.u32 %v1090_v28, 16 }
 0x1dc   : > { %v1067_v61 = vpack.i.b16 %v1066_v57, %v1065_v52  ;;  %1070 = vst.msk [vmem:[#allocation2] sm:$0xf] %vm1069_vm2, %v1063_v56  ;;  %v1410_v63 = vrot.slane %v1403_v59, %v3133_v38  ;;  %v1387_v5 = vcombine.low %v1378_v2, %v1386_v1  ;;  %v1137_v24 = vshrl.u32 %v1098_v14, 16 }
 0x1dd   : > { %v1122_v26 = vrot.slane %v1108_v20, %v3136_v41  ;;  %v1123_v27 = vcombine.high %v1115_v21, %v2789_v9  ;;  %v1130_v29 = vshrl.u32 %v1115_v21, 16  ;;  %v1145_v30 = vshrl.u32 %v1097_v7, 16 }
 0x1de   : > { %1071 = vst.msk [vmem:[#allocation2 + $0x4] sm:$0xf] %vm1069_vm2, %v1067_v61  ;;  %v1411_v4 = vcombine.low %v1402_v53, %v1410_v63  ;;  %v1394_v13 = vrot.slane %v1387_v5, %v3136_v41  ;;  %v1153_v31 = vshrl.u32 %v1099_v18, 16  ;;  %v1127_v32 = vpack.i.b16 %v1115_v21, %v1090_v28 }
 0x1df   : > { %v1124_v34 = vcombine.high %v1122_v26, %v2789_v9  ;;  %v1135_v35 = vpack.i.b16 %v1123_v27, %v1098_v14  ;;  %v1138_v36 = vshrl.u32 %v1123_v27, 16  ;;  %v1131_v37 = vpack.i.b16 %v1130_v29, %v1129_v23 }
 0x1e0   : > { %v1418_v11 = vrot.slane %v1411_v4, %v3136_v41  ;;  %v1422_v22 = vshrl.u32 %v1394_v13, 16  ;;  %v1143_v39 = vpack.i.b16 %v1122_v26, %v1097_v7  ;;  %v1146_v40 = vshrl.u32 %v1122_v26, 16  ;;  %v1217_v4 = vld [vmem:[%s700_s0] sm:$0xf]  ;;  %s3440_s0 = sld [smem:[#allocation36_spill]] }
 0x1e1   : > { %v1139_v42 = vpack.i.b16 %v1138_v36, %v1137_v24  ;;  %v1151_v43 = vpack.i.b16 %v1124_v34, %v1099_v18  ;;  %v1154_v44 = vshrl.u32 %v1124_v34, 16  ;;  %vm1522_vm5 = vcmp.gt.bf16.partialorder %v1217_v4, 1056980736  ;;  %v2533_v34 = vld [vmem:[%s3361_s10] sm:$0xff]  }
 0x1e2   : > { %v1423_v19 = vshrl.u32 %v1418_v11, 16  ;;  %v1421_v25 = vpack.i.b16 %v1418_v11, %v1394_v13  ;;  %v1147_v45 = vpack.i.b16 %v1146_v40, %v1145_v30  ;;  %v1157_v46 = vcombine.low %v1127_v32, %v1143_v39 }
 0x1e3   : > { %v1425_v6 = vld [vmem:[#allocation2] sm:$0xf]  ;;  %v1155_v47 = vpack.i.b16 %v1154_v44, %v1153_v31  ;;  %v1165_v48 = vcombine.low %v1135_v35, %v1151_v43  ;;  %v1523_v5 = vsel %vm1522_vm5, 65537, %v2789_v9 }
 0x1e4   : > { %v1434_v10 = vsel %vm1429_vm3, %v1425_v6, 0  ;;  %v1424_v33 = vpack.i.b16 %v1423_v19, %v1422_v22  ;;  %v1164_v49 = vrot.slane %v1157_v46, %v3133_v38  ;;  %v1181_v50 = vcombine.low %v1131_v37, %v1147_v45 }
 0x1e5   : > { %2373 = vmatpush3.bf16.xpose.msra.mxu1 %v1434_v10  ;;  %v1426_v12 = vld [vmem:[#allocation2 + $0x4] sm:$0xf]  ;;  %v1172_v51 = vrot.slane %v1165_v48, %v3133_v38  ;;  %v1189_v52 = vcombine.low %v1139_v42, %v1155_v47  ;;  %v1524_v28 = vunpack.c.l.b16 %v1523_v5 }
 0x1e6   : > { %v1480_v16 = vsel %vm1429_vm3, %v1426_v12, 0  ;;  %2384 = vmatprep.subr.bf16.mxu1 %v2787_v0  ;;  %v1188_v54 = vrot.slane %v1181_v50, %v3133_v38 }
 0x1e7   : > { %2379 = vmatpush3.bf16.xpose.msra.mxu0 %v1480_v16  ;;  %v1173_v55 = vcombine.low %v1164_v49, %v1172_v51  ;;  %v1196_v56 = vrot.slane %v1189_v52, %v3133_v38  ;;  %vm1525_vm6 = vcmp.ne.s32.totalorder %v1524_v28, 0 }
 0x1e8   : > { %2390 = vmatprep.subr.bf16.mxu0 %v2787_v0 }
 0x1e9   : > { %v1180_v57 = vrot.slane %v1173_v55, %v3136_v41  ;;  %v1197_v58 = vcombine.low %v1188_v54, %v1196_v56 }
 0x1eb   : > { %v1204_v59 = vrot.slane %v1197_v58, %v3136_v41  ;;  %v1209_v60 = vshrl.u32 %v1180_v57, 16 }
 0x1ec   : > { %2375 = vmatmul.mubr.msk.bf16.vlgmr.msra.gmra.mxu1 %vm1429_vm3, %v1421_v25 }
 0x1ed   : > { %2386 = vmatprep.mubr.msk.bf16.mxu1 %vm2788_vm0, %v2787_v0  ;;  %v1207_v62 = vpack.i.b16 %v1204_v59, %v1180_v57  ;;  %v1210_v61 = vshrl.u32 %v1204_v59, 16 }
 0x1ee   : > { %2381 = vmatmul.mubr.msk.bf16.vlgmr.msra.gmra.mxu0 %vm1429_vm3, %v1424_v33  ;;  %v2532_v33 = vld [vmem:[%s3361_s10 + $0x8] sm:$0xff]  }
 0x1ef   : > { %2392 = vmatprep.mubr.msk.bf16.mxu0 %vm2788_vm0, %v2787_v0  ;;  %v1211_v63 = vpack.i.b16 %v1210_v61, %v1209_v60  ;;  %1213 = vst.msk [vmem:[#allocation3] sm:$0xf] %vm1069_vm2, %v1207_v62 }
 0x1f1   : > { %1214 = vst.msk [vmem:[#allocation3 + $0x4] sm:$0xf] %vm1069_vm2, %v1211_v63 }
 0x1f6   : > { %v1427_v1 = vld [vmem:[#allocation3] sm:$0xf] }
 0x1f7   : > { %v1566_v53 = vsel %vm1564_vm4, %v1427_v1, 0 }
 0x1f8   : > { %2385 = vmatpush3.bf16.msra.mxu1 %v1566_v53  ;;  %v1428_v2 = vld [vmem:[#allocation3 + $0x4] sm:$0xf] }
 0x1f9   : > { %v1612_v3 = vsel %vm1564_vm4, %v1428_v2, 0  ;;  %2396 = vmatprep.subr.bf16.mxu1 %v2787_v0 }
 0x1fa   : > { %2391 = vmatpush3.bf16.msra.mxu0 %v1612_v3 }
 0x1fb   : > { %2404 = vmatprep.subr.bf16.mxu0 %v2787_v0 }
 0x2ac   : > { %v1470_v6 = vpop.f32.mrf.mxu1 }
 0x2ad   : > { %v1528_v7 = vsel %vm1525_vm6, -1e+10, %v1470_v6 }
 0x2ae   : > { %v2376_v10 = vpop.f32.mrf.mxu1  ;;  %v1516_v11 = vpop.f32.mrf.mxu0  ;;  %v1531_v12 = vsel %vm1530_vm7, %v1528_v7, -inf }
 0x2af   : > { %v1529_v13 = vsel %vm1525_vm6, -1e+10, %v1516_v11  ;;  %1532 = vmax.xlane.f32.xlu1 %v1531_v12 }
 0x2b0   : > { %v1473_v14 = vpop.f32.mrf.mxu1  ;;  %v2382_v15 = vpop.f32.mrf.mxu0  ;;  %v1534_v16 = vsel %vm1530_vm7, %v1529_v13, -inf }
 0x2b1   : > { %1535 = vmax.xlane.f32.xlu0 %v1534_v16 }
 0x2b2   : > { %v2377_v17 = vpop.f32.mrf.mxu1  ;;  %v1519_v18 = vpop.f32.mrf.mxu0 }
 0x2b4   : > { %v2383_v19 = vpop.f32.mrf.mxu0 }
 0x338   : > { %v1533_v20 = vpop.xlane.xlu1 %1532 }
 0x339   : > { %v1543_v21 = vsub.f32 %v1528_v7, %v1533_v20  ;;  %v1537_v35 = vsub.f32 -inf, %v1533_v20 }
 0x33a   : > { %v1536_v22 = vpop.xlane.xlu0 %1535 }
 0x33b   : > { %v1545_v23 = vmul.f32 1.442695, %v1543_v21  ;;  %v1544_v24 = vsub.f32 %v1529_v13, %v1536_v22  ;;  %v1538_v36 = vsub.f32 -inf, %v1536_v22  ;;  %v1539_v37 = vmul.f32 1.442695, %v1537_v35 }
 0x33d   : > { %v1547_v25 = vmul.f32 1.442695, %v1544_v24  ;;  %2540 = vpow2.f32 %v1545_v23  ;;  %v1541_v39 = vmul.f32 1.442695, %v1538_v36 }
 0x33f   : > { %2542 = vpow2.f32 %v1547_v25 }
 0x340   : > { %2544 = vpow2.f32 %v1539_v37 }
 0x341   : > { %2546 = vpow2.f32 %v1541_v39 }
 0x34a   : > { %v2541_v26 = vpop.eup %2540 }
 0x34b   : > { %v1551_v27 = vsel %vm1530_vm7, %v2541_v26, 0.0  ;;  %v1559_v29 = vpack.c.bf16 %v2541_v26, %v2541_v26 }
 0x34c   : > { %v2543_v30 = vpop.eup %2542  ;;  %1552 = vadd.xlane.f32.xlu0 %v1551_v27 }
 0x34d   : > { %2387 = vmatmul.mubr.msk.bf16.vlgmr.msra.gmra.mxu1 %vm1530_vm7, %v1559_v29  ;;  %v1554_v31 = vsel %vm1530_vm7, %v2543_v30, 0.0  ;;  %v1560_v32 = vpack.c.bf16 %v2543_v30, %v2543_v30  ;;  %v2545_v40 = vpop.eup %2544 }
 0x34e   : > { %1555 = vadd.xlane.f32.xlu1 %v1554_v31  ;;  %2400 = vmatprep.mubr.msk.bf16.mxu1 %vm2788_vm0, %v2787_v0  ;;  %v2547_v42 = vpop.eup %2546  ;;  %v1549_v44 = vmul.f32 0.0, %v2545_v40 }
 0x34f   : > { %2393 = vmatmul.mubr.msk.bf16.vlgmr.msra.gmra.mxu0 %vm1530_vm7, %v1560_v32  ;;  %2397 = vmatpush3.bf16.msra.mxu1 %v2532_v33  ;;  %v1550_v47 = vmul.f32 0.0, %v2547_v42 }
 0x350   : > { %2408 = vmatprep.mubr.msk.bf16.mxu0 %vm2788_vm0, %v2787_v0  ;;  %2398 = vmatprep.subr.bf16.mxu1 %v2787_v0 }
 0x353   : > { %2399 = vmatpush3.bf16.msra.mxu1 %v2533_v34 }
 0x354   : > { %2412 = vmatprep.subr.bf16.mxu1 %v2787_v0 }
 0x3d5   : > { %v1553_v43 = vpop.xlane.xlu0 %1552 }
 0x3d6   : > { %v1557_v46 = vadd.f32 %v1553_v43, %v1549_v44 }
 0x3d7   : > { %v1556_v45 = vpop.xlane.xlu1 %1555 }
 0x3d8   : > { %v1558_v48 = vadd.f32 %v1556_v45, %v1550_v47  ;;  %2548 = vrcp.f32 %v1557_v46 }
 0x3da   : > { %2550 = vrcp.f32 %v1558_v48 }
 0x3e5   : > { %v2549_v51 = vpop.eup %2548 }
 0x3e7   : > { %v2551_v57 = vpop.eup %2550 }
 0x40d   : > { %v1602_v49 = vpop.f32.mrf.mxu1 }
 0x40e   : > { %v1654_v50 = vadd.f32 %v1602_v49, %v1549_v44 }
 0x40f   : > { %v2388_v52 = vpop.f32.mrf.mxu1  ;;  %v1648_v54 = vpop.f32.mrf.mxu0 }
 0x410   : > { %v1658_v55 = vmul.f32 %v2549_v51, %v1654_v50  ;;  %v1655_v56 = vadd.f32 %v1648_v54, %v1550_v47 }
 0x411   : > { %v1605_v58 = vpop.f32.mrf.mxu1  ;;  %v2394_v59 = vpop.f32.mrf.mxu0 }
 0x412   : > { %v1660_v60 = vpack.c.bf16 %v1658_v55, %v1658_v55  ;;  %v1659_v62 = vmul.f32 %v2551_v57, %v1655_v56 }
 0x413   : > { %v2389_v61 = vpop.f32.mrf.mxu1  ;;  %v1651_v63 = vpop.f32.mrf.mxu0 }
 0x414   : > { %v1667_v1 = vrot.slane %v1660_v60, %v3133_v38  ;;  %v1685_v53 = vpack.c.bf16 %v1659_v62, %v1659_v62 }
 0x415   : > { %v2395_v2 = vpop.f32.mrf.mxu0 }
 0x416   : > { %v1668_v3 = vcombine.high %v1667_v1, %v2789_v9  ;;  %v1675_v4 = vrot.slane %v1667_v1, %v3136_v41  ;;  %v1692_v5 = vrot.slane %v1685_v53, %v3133_v38  ;;  %v2534_v1 = vld [vmem:[%s3439_s5 + $0x8] sm:$0xff]   ;;  %v2535_v53 = vld [vmem:[%s3439_s5] sm:$0xff]   ;;  %v2536_v2 = vld [vmem:[%s3440_s0 + $0x18] sm:$0xff]  }
 0x417   : > { %2405 = vmatpush3.bf16.msra.mxu0 %v2534_v1 }
 0x418   : > { %v1682_v28 = vrot.slane %v1668_v3, %v3136_v41  ;;  %v1683_v6 = vcombine.high %v1675_v4, %v2789_v9  ;;  %v1693_v7 = vcombine.high %v1692_v5, %v2789_v9  ;;  %v1700_v10 = vrot.slane %v1692_v5, %v3136_v41  ;;  %2406 = vmatprep.subr.bf16.mxu0 %v2787_v0  ;;  %v2537_v3 = vld [vmem:[%s3440_s0 + $0x10] sm:$0xff]  }
 0x419   : > { %v1714_v12 = vshrl.u32 %v1675_v4, 16 }
 0x41a   : > { %v1684_v11 = vcombine.high %v1682_v28, %v2789_v9  ;;  %v1707_v13 = vrot.slane %v1693_v7, %v3136_v41  ;;  %v1722_v14 = vshrl.u32 %v1683_v6, 16  ;;  %v1730_v15 = vshrl.u32 %v1682_v28, 16  ;;  %v2302_v7 = vld [vmem:[%s3441_s17] ss:$0 sm:$0xff]  ;;  %s3445_s17 = sld [smem:[#allocation38_spill]] }
 0x41b   : > { %v1708_v16 = vcombine.high %v1700_v10, %v2789_v9  ;;  %v1715_v17 = vshrl.u32 %v1700_v10, 16  ;;  %v1712_v19 = vpack.i.b16 %v1700_v10, %v1675_v4  ;;  %2407 = vmatpush3.bf16.msra.mxu0 %v2535_v53 }
 0x41c   : > { %v1709_v18 = vcombine.high %v1707_v13, %v2789_v9  ;;  %v1728_v20 = vpack.i.b16 %v1707_v13, %v1682_v28  ;;  %v1731_v21 = vshrl.u32 %v1707_v13, 16  ;;  %v1738_v22 = vshrl.u32 %v1684_v11, 16 }
 0x41d   : > { %v1716_v23 = vpack.i.b16 %v1715_v17, %v1714_v12  ;;  %v1720_v24 = vpack.i.b16 %v1708_v16, %v1683_v6  ;;  %v1723_v25 = vshrl.u32 %v1708_v16, 16  ;;  %v2538_v17 = vld [vmem:[%s3440_s0 + $0x8] sm:$0xff]  }
 0x41e   : > { %v1732_v26 = vpack.i.b16 %v1731_v21, %v1730_v15  ;;  %v1736_v27 = vpack.i.b16 %v1709_v18, %v1684_v11  ;;  %v1739_v29 = vshrl.u32 %v1709_v18, 16  ;;  %v1742_v30 = vcombine.low %v1712_v19, %v1728_v20  ;;  %v2303_v11 = vld [vmem:[%s3442_s1] ss:$0 sm:$0xff]  ;;  %s3446_s1 = sld [smem:[#allocation39_spill]] }
 0x41f   : > { %v1724_v31 = vpack.i.b16 %v1723_v25, %v1722_v14  ;;  %v2539_v18 = vld [vmem:[%s3440_s0] sm:$0xff]  }
 0x420   : > { %v1740_v32 = vpack.i.b16 %v1739_v29, %v1738_v22  ;;  %v1750_v33 = vcombine.low %v1720_v24, %v1736_v27  ;;  %v1766_v34 = vcombine.low %v1716_v23, %v1732_v26  ;;  %v1749_v35 = vrot.slane %v1742_v30, %v3133_v38  ;;  %v2304_v19 = vld [vmem:[%s3443_s4] ss:$0 sm:$0xff]  ;;  %s3448_s4 = sld [smem:[#allocation40_spill]] }
 0x422   : > { %v1757_v36 = vrot.slane %v1750_v33, %v3133_v38  ;;  %v1774_v9 = vcombine.low %v1724_v31, %v1740_v32  ;;  %v1773_v39 = vrot.slane %v1766_v34, %v3133_v38 }
 0x424   : > { %v1758_v37 = vcombine.low %v1749_v35, %v1757_v36  ;;  %v1781_v40 = vrot.slane %v1774_v9, %v3133_v38  ;;  %v2298_v38 = vld [vmem:[%s3362_s11] ss:$0 sm:$0xff] }
 0x426   : > { %v1765_v42 = vrot.slane %v1758_v37, %v3136_v41  ;;  %v1782_v43 = vcombine.low %v1773_v39, %v1781_v40 }
 0x428   : > { %v1789_v44 = vrot.slane %v1782_v43, %v3136_v41  ;;  %v1793_v45 = vshrl.u32 %v1765_v42, 16  ;;  %v1216_v41 = vunpack.c.l.bf16 %v3115_v8  ;;  %v1218_v8 = vld [vmem:[%s788_s21] sm:$0xff]  ;;  %s2317_s21 = sshll.u32 %s3437_s2, 6 }
 0x429   : > { %s2102_s30 = scalar_lea.hbm %s3448_s4, %s2317_s21 }
 0x42a   : > { %v1794_v46 = vshrl.u32 %v1789_v44, 16  ;;  %v1792_v47 = vpack.i.b16 %v1789_v44, %v1765_v42 }
 0x42c   : > { %v1795_v48 = vpack.i.b16 %v1794_v46, %v1793_v45  ;;  %v2314_v45 = vld [vmem:[%s3445_s17] ss:$0 sm:$0xff] }
 0x42e   : > { %1796 = vrot.lane.b32.xlu0 %v1795_v48, %s2793_s12  ;;  %s3444_s12 = sld [smem:[#allocation37_spill]] }
 0x4a0   : > { %v1797_v49 = vpop.permute.xlu0 %1796 }
 0x4a1   : > { %v1800_v50 = vsel %vm1429_vm3, %v1792_v47, %v1797_v49  ;;  %v2315_v47 = vld [vmem:[%s3446_s1] ss:$0 sm:$0xff] }
 0x4a2   : > { %2401 = vmatmul.mubr.msk.bf16.vlgmr.msra.gmra.mxu1 %vm821_vm1, %v1800_v50 }
 0x4a3   : > { %2420 = vmatprep.mubr.msk.bf16.mxu1 %vm2788_vm0, %v2787_v0  ;;  %2413 = vmatpush3.bf16.msra.mxu1 %v2536_v2 }
 0x4a4   : > { %2414 = vmatprep.subr.bf16.mxu1 %v2787_v0 }
 0x4a7   : > { %2415 = vmatpush3.bf16.msra.mxu1 %v2537_v3 }
 0x4a8   : > { %2416 = vmatprep.subr.bf16.mxu1 %v2787_v0 }
 0x4ab   : > { %2417 = vmatpush3.bf16.msra.mxu1 %v2538_v17 }
 0x4ac   : > { %2418 = vmatprep.subr.bf16.mxu1 %v2787_v0  ;;  %v2308_v0 = vld [vmem:[%s3444_s12] ss:$0 sm:$0xff]  ;;  %s2692_s12 = scalar_lea.vmem %s2105_s24, 64 }
 0x4ad   : > { %p2693_p9 = scmp.ne.s32.totalorder %s2105_s24, %s2692_s12  ;;  %p2700_p0 = scmp.lt.s32.totalorder %s2698_s26, %s2692_s12 }
 0x4af   : > { %2419 = vmatpush3.bf16.msra.mxu1 %v2539_v18  ;;  %p2694_p5 = pnand %p2693_p9, %p3449_p3  ;;  %p2701_p4 = por %p2700_p0, %p2699_p1 }
 0x4b1   : > { %p2695_p10 = pneg %p2694_p5 }
 0x4b3   : > { %p2702_p6 = pnand %p2701_p4, %p2695_p10 }
 0x562   : > { %v1860_v51 = vpop.f32.mrf.mxu1 }
 0x563   : > { %v1861_v52 = vadd.f32 %v2298_v38, %v1860_v51 }
 0x564   : > { %v2402_v54 = vpop.f32.mrf.mxu1 }
 0x565   : > { %v1866_v55 = vadd.f32 %v1861_v52, %v1216_v41 }
 0x566   : > { %v1863_v56 = vpop.f32.mrf.mxu1 }
 0x567   : > { %v1869_v57 = vsel %vm821_vm1, %v1866_v55, 0.0 }
 0x568   : > { %1870 = vadd.xlane.f32.xlu1 %v1869_v57  ;;  %v2403_v58 = vpop.f32.mrf.mxu1 }
 0x5f1   : > { %v1871_v59 = vpop.xlane.xlu1 %1870 }
 0x5f2   : > { %v1873_v60 = vmul.f32 0.03125, %v1871_v59 }
 0x5f4   : > { %v1874_v62 = vsub.f32 %v1866_v55, %v1873_v60 }
 0x5f6   : > { %v1875_v61 = vmul.f32 %v1874_v62, %v1874_v62 }
 0x5f8   : > { %v1876_v63 = vsel %vm821_vm1, %v1875_v61, 0.0 }
 0x5f9   : > { %1877 = vadd.xlane.f32.xlu1 %v1876_v63 }
 0x60a   : > { %1899 = vperm.xlu1 %2524, %v1218_v8  }
 0x682   : > { %v1878_v4 = vpop.xlane.xlu1 %1877 }
 0x683   : > { %v1879_v5 = vmul.f32 0.03125, %v1878_v4 }
 0x685   : > { %v1880_v28 = vadd.f32 1e-05, %v1879_v5 }
 0x686   : > { %v1900_v13 = vpop.permute.xlu1 %1899 }
 0x687   : > { %2552 = vrsqrt.f32 %v1880_v28 }
 0x694   : > { %v2553_v6 = vpop.eup %2552 }
 0x695   : > { %v1882_v10 = vmul.f32 %v2553_v6, %v1874_v62 }
 0x697   : > { %v1889_v12 = vmul.f32 %v2302_v7, %v1882_v10 }
 0x699   : > { %v1896_v14 = vadd.f32 %v2303_v11, %v1889_v12 }
 0x69b   : > { %v1902_v15 = vmul.f32 %v1900_v13, %v1896_v14 }
 0x69d   : > { %v1903_v16 = vpack.c.bf16 %v1902_v15, %v1902_v15 }
 0x69f   : > { %2409 = vmatmul.mubr.msk.bf16.vlgmr.msra.gmra.mxu0 %vm821_vm1, %v1903_v16 }
 0x75f   : > { %v1964_v20 = vpop.f32.mrf.mxu0 }
 0x760   : > { %v1965_v21 = vadd.f32 %v2304_v19, %v1964_v20 }
 0x761   : > { %v2410_v22 = vpop.f32.mrf.mxu0 }
 0x762   : > { %v1970_v23 = vmax.f32 %v1965_v21, 0.0 }
 0x763   : > { %v1967_v24 = vpop.f32.mrf.mxu0 }
 0x764   : > { %v1971_v25 = vpack.c.bf16 %v1970_v23, %v1970_v23 }
 0x765   : > { %v2411_v26 = vpop.f32.mrf.mxu0 }
 0x766   : > { %2421 = vmatmul.mubr.msk.bf16.vlgmr.msra.gmra.mxu1 %vm2011_vm8, %v1971_v25 }
 0x826   : > { %v2049_v27 = vpop.f32.mrf.mxu1 }
 0x827   : > { %v2050_v29 = vadd.f32 %v2308_v0, %v2049_v27 }
 0x828   : > { %v2422_v30 = vpop.f32.mrf.mxu1 }
 0x829   : > { %v2055_v31 = vadd.f32 %v2050_v29, %v1902_v15 }
 0x82a   : > { %v2052_v32 = vpop.f32.mrf.mxu1 }
 0x82b   : > { %v2058_v33 = vsel %vm821_vm1, %v2055_v31, 0.0 }
 0x82c   : > { %2059 = vadd.xlane.f32.xlu0 %v2058_v33  ;;  %v2423_v34 = vpop.f32.mrf.mxu1 }
 0x8b5   : > { %v2060_v35 = vpop.xlane.xlu0 %2059 }
 0x8b6   : > { %v2061_v36 = vmul.f32 0.03125, %v2060_v35 }
 0x8b8   : > { %v2062_v9 = vsub.f32 %v2055_v31, %v2061_v36 }
 0x8ba   : > { %v2063_v37 = vmul.f32 %v2062_v9, %v2062_v9 }
 0x8bc   : > { %v2064_v39 = vsel %vm821_vm1, %v2063_v37, 0.0 }
 0x8bd   : > { %2065 = vadd.xlane.f32.xlu1 %v2064_v39 }
 0x946   : > { %v2066_v40 = vpop.xlane.xlu1 %2065 }
 0x947   : > { %v2067_v42 = vmul.f32 0.03125, %v2066_v40 }
 0x949   : > { %v2068_v43 = vadd.f32 1e-05, %v2067_v42 }
 0x94b   : > { %2554 = vrsqrt.f32 %v2068_v43 }
 0x958   : > { %v2555_v44 = vpop.eup %2554 }
 0x959   : > { %v2070_v46 = vmul.f32 %v2555_v44, %v2062_v9 }
 0x95b   : > { %v2077_v48 = vmul.f32 %v2314_v45, %v2070_v46 }
 0x95d   : > { %v2084_v49 = vadd.f32 %v2315_v47, %v2077_v48 }
 0x95f   : > { %v2085_v50 = vmul.f32 %v2084_v49, %v1900_v13 }
 0x961   : > { %v2086_v38 = vpack.c.bf16 %v2085_v50, %v2085_v50 }
 0x963   : > { %2088 = vst.msk [vmem:[%s781_s19] sm:$0xf] %vm2087_vm9, %v2086_v38 }
 0x964   : > { %2705 = shalt.err (!%p2702_p6)
}
 0x965   : > { %s2706_s2 = scalar_lea.hbm %s2102_s30, 64  ;;  %s2710_s14 = scalar_lea.hbm %s3448_s4, 128 }
 0x966   : > { %p2707_p8 = scmp.ne.s32.totalorder %s2102_s30, %s2706_s2  ;;  %p2711_p12 = scmp.lt.s32.totalorder %s2102_s30, %s3448_s4 }
 0x967   : > { %p2712_p7 = scmp.lt.s32.totalorder %s2710_s14, %s2706_s2 }
 0x968   : > { %p2708_p13 = pnand %p2707_p8, %p3449_p3 }
 0x969   : > { %p2713_p2 = por %p2712_p7, %p2711_p12 }
 0x96a   : > { %p2709_p11 = pneg %p2708_p13 }
 0x96c   : > { %p2714_p9 = pnand %p2713_p2, %p2709_p11 }
 0x96e   : > { %2717 = shalt.err (!%p2714_p9)
}
 0x96f   : > { %2438 = dma.vmem_to_hbm [thread:$0]  (%p3449_p3), %s2105_s24, 64, %s2102_s30, %s2090_s27  }
 0x970 PF: > { %s3450_s21 = sld [smem:[#allocation18_spill]] }
 0x971   : > { %s3451_s19 = sld [smem:[#allocation22_spill]] }
 0x972   : > { %s3452_s25 = sld [smem:[#allocation21_spill]] }
 0x976   : > { %s2116_s13 = sand.u32 1, %s3450_s21  }
 0x977   : > { %p3453_p5 = scmp.ne.s32.totalorder %s3451_s19, 0  ;;  %s2117_s12 = scalar_lea.sflag [#allocation6], %s2116_s13 }
 0x978   : > { %p3454_p10 = scmp.ge.s32.totalorder %s3452_s25, 2 }
 0x97a   : > { %p2458_p1 = pnand %p3454_p10, %p3453_p5 }
 0x97c   : > { %p2459_p0 = pneg %p2458_p1 }
 0x97e   : > { %2755 = dma.done.wait (%p2459_p0), %s2117_s12, 64  }
 0x97f   : > { %2757 = vsyncadd (%p2459_p0), %s2117_s12, 4294967232  ;;  %s40_s25 = sadd.s32 1, %s3452_s25   ;;  %s3455_s15 = sld [smem:[#allocation25_spill]] }
 0x980   : > { %p37_p4 = scmp.ge.s32.totalorder %s40_s25, 4   ;;  %s3456_s24 = sld [smem:[#allocation20_spill]] }
 0x981   : > { %s3457_s2 = sld [smem:[#allocation23_spill]]  ;;  %s3458_s1 = smov %s2764_s22 }
 0x982   : > { %s3459_s22 = smov %s2768_s23  ;;  %39 = sbr.rel (!%p37_p4) target bundleno = 25 (0x19), region = 184 }
 0x985   : > { %s3460_s23 = smov %s3455_s15 }
 0x987   :  { %2122 = vsyncpa [#allocation5], 1 }
 0x988   :  { %2124 = vsyncpa [#allocation5 + $0x1], 1 }
 0x989   :  { %2125 = vsyncpa [#allocation8], 1 }
 0x98a   :  { %2127 = vsyncpa [#allocation8 + $0x1], 1 }
 0x98b   :  { %2128 = vsyncpa [#allocation11], 1 }
 0x98c   :  { %2129 = vsyncpa [#allocation6], 1 }
 0x98d   :  { %2131 = vsyncpa [#allocation6 + $0x1], 1 }

</bundles_post_ra>
